<compile_context>
chip_gen: v7x
topology: tpu7x:2x2x1
jax: 0.10.0
libtpu: 0.0.40
codegen_flags: <defaults>
</compile_context>

<pallas_src>
import functools

import jax
import jax.numpy as jnp
import numpy as np
from jax import lax
from jax.experimental import pallas as pl
from jax.experimental.pallas import tpu as pltpu

_UNROLL_MAX_T = 64      # beyond this, use fori_loop + per-step stores (R7)
_MAX_BATCH_BLOCK = 8    # batch rows per grid step (multiple of the 8-sublane tile)


def _make_kernel(seq_len: int, batch_blk: int, hidden_dim: int,
                 dense: bool, unrolled: bool):
    T, B, H = seq_len, batch_blk, hidden_dim

    def kernel(*refs):
        x_ref, w_ih_ref, w_hh_ref, b_ref, w_fin_ref, b_fin_ref = refs[:6]
        if dense:
            w_lin_ref, b_lin_ref = refs[6], refs[7]
            out_ref = refs[8]
        else:
            out_ref = refs[6]

        # Loop-invariant weights: loaded once, held vreg-resident across steps.
        # TODO(synk): latch W_hh in the MXU weight registers via
        # pltpu.matmul_push_rhs / matmul_acc_lhs / matmul_pop (R2).
        w_ih = [w_ih_ref[g] for g in range(4)]        # (D, H) f32, order [i, f, g, o]
        w_hh = [w_hh_ref[g] for g in range(4)]        # (H, H) bf16 (R1)
        bias = [b_ref[g] for g in range(4)]           # (1, H) f32, b_ih + b_hh fused
        w_fin = w_fin_ref[...]                        # (1, H) f32
        b_fin = b_fin_ref[...]                        # (1, 1) f32
        if dense:
            w_lin = w_lin_ref[...]                    # (H, H) f32 (pre-transposed)
            b_lin = b_lin_ref[...]                    # (1, H) f32

        def lstm_step(x_t, h, c):
            # Per-gate (B, .) dots; every operand sits at lane offset 0, so the
            # serial chain has no lane rotations (R5).  The recurrent matmul is
            # a single-pass bf16 MXU op with f32 accumulation (R1).
            hb = h.astype(jnp.bfloat16)
            pre = [jnp.dot(x_t, w_ih[g], preferred_element_type=jnp.float32)
                   + jnp.dot(hb, w_hh[g], preferred_element_type=jnp.float32)
                   + bias[g]
                   for g in range(4)]
            i_g = jax.nn.sigmoid(pre[0])
            f_g = jax.nn.sigmoid(pre[1])
            g_g = jnp.tanh(pre[2])
            o_g = jax.nn.sigmoid(pre[3])
            c = f_g * c + i_g * g_g
            h = o_g * jnp.tanh(c)
            return h, c

        def head(h):
            # act1 -> [Linear(H,H) -> act2] -> Linear(H,1).  Off the recurrent
            # critical path; the final H->1 is a VPU multiply + lane reduction.
            a = jnp.maximum(h, 0.0)
            if dense:
                a = jnp.dot(a, w_lin, preferred_element_type=jnp.float32) + b_lin
                a = jnp.maximum(a, 0.0)
            return jnp.sum(a * w_fin, axis=-1, keepdims=True) + b_fin   # (B, 1)

        h = jnp.zeros((B, H), jnp.float32)
        c = jnp.zeros((B, H), jnp.float32)

        if unrolled:
            # Fully unrolled: static slices, one concatenated output store.
            ys = []
            for t in range(T):
                h, c = lstm_step(x_ref[t], h, c)
                ys.append(head(h)[None])                      # (1, B, 1)
            out_ref[...] = jnp.concatenate(ys, axis=0)        # (T, B, 1)
        else:
            # Long-sequence path (R7): bounded live ranges, per-step store.
            def body(t, carry):
                h_t, c_t = lstm_step(x_ref[t], *carry)
                out_ref[t] = head(h_t)
                return (h_t, c_t)

            lax.fori_loop(0, T, body, (h, c), unroll=8)

    return kernel


def _split_gates(w, H):
    # PyTorch packs LSTM weights as (4H, X) in gate order [i, f, g, o]; split
    # and transpose per gate so the kernel computes row @ (X, H) at lane offset 0.
    return jnp.stack([w[g * H:(g + 1) * H].T for g in range(4)], axis=0)


def init_params(key, input_dim, hidden_dim):
    """Deterministic PyTorch-style uniform init for all parameters."""
    D, H = input_dim, hidden_dim
    keys = jax.random.split(key, 8)
    k_lstm = 1.0 / np.sqrt(H)

    def u(k, shape, bound):
        return jax.random.uniform(k, shape, jnp.float32, -bound, bound)

    return dict(
        w_ih=u(keys[0], (4 * H, D), k_lstm),          # nn.LSTM weight_ih_l0
        w_hh=u(keys[1], (4 * H, H), k_lstm),          # nn.LSTM weight_hh_l0
        b_ih=u(keys[2], (4 * H,), k_lstm),
        b_hh=u(keys[3], (4 * H,), k_lstm),
        w_lin=u(keys[4], (H, H), 1.0 / np.sqrt(H)),   # nn.Linear(H, H)
        b_lin=u(keys[5], (H,), 1.0 / np.sqrt(H)),
        w_fin=u(keys[6], (1, H), 1.0 / np.sqrt(H)),   # nn.Linear(H, 1)
        b_fin=u(keys[7], (1,), 1.0 / np.sqrt(H)),
    )


@functools.partial(jax.jit, static_argnames=("hidden_dim", "dense"))
def dense_lstm_forward_batched(inputs, params, *, hidden_dim, dense=False):
    """inputs: (T, B, D) float32, seq-major.  Returns (T, B, 1) float32."""
    T, B, D = inputs.shape
    H = hidden_dim

    w_ih_s = _split_gates(params["w_ih"], H).astype(jnp.float32)    # (4, D, H)
    w_hh_s = _split_gates(params["w_hh"], H).astype(jnp.bfloat16)   # (4, H, H)  R1
    b = params["b_ih"] + params["b_hh"]
    b_s = jnp.stack([b[g * H:(g + 1) * H].reshape(1, H) for g in range(4)],
                    axis=0)                                         # (4, 1, H)
    w_fin = params["w_fin"].reshape(1, H).astype(jnp.float32)
    b_fin = params["b_fin"].reshape(1, 1).astype(jnp.float32)

    batch_blk = B if B <= _MAX_BATCH_BLOCK else _MAX_BATCH_BLOCK
    grid = (pl.cdiv(B, batch_blk),)
    unrolled = T <= _UNROLL_MAX_T

    in_specs = [
        pl.BlockSpec((T, batch_blk, D), lambda i: (0, i, 0)),
        pl.BlockSpec((4, D, H), lambda i: (0, 0, 0)),
        pl.BlockSpec((4, H, H), lambda i: (0, 0, 0)),
        pl.BlockSpec((4, 1, H), lambda i: (0, 0, 0)),
        pl.BlockSpec((1, H), lambda i: (0, 0)),
        pl.BlockSpec((1, 1), lambda i: (0, 0)),
    ]
    args = [inputs.astype(jnp.float32), w_ih_s, w_hh_s, b_s, w_fin, b_fin]
    if dense:
        args += [params["w_lin"].T.astype(jnp.float32),
                 params["b_lin"].reshape(1, H).astype(jnp.float32)]
        in_specs += [pl.BlockSpec((H, H), lambda i: (0, 0)),
                     pl.BlockSpec((1, H), lambda i: (0, 0))]

    out = pl.pallas_call(
        _make_kernel(T, batch_blk, H, dense, unrolled),
        out_shape=jax.ShapeDtypeStruct((T, B, 1), jnp.float32),
        grid=grid,
        in_specs=in_specs,
        out_specs=pl.BlockSpec((T, batch_blk, 1), lambda i: (0, i, 0)),
        compiler_params=pltpu.CompilerParams(
            dimension_semantics=("parallel",)),   # R4: v7x shards blocks over both TCs
    )(*args)
    return out


def dense_lstm_forward(inputs, params, *, hidden_dim, dense=False):
    """Module-equivalent forward: inputs (T, D) -> (T, 1, 1) (PyTorch unsqueeze(1))."""
    return dense_lstm_forward_batched(inputs[:, None, :], params,
                                      hidden_dim=hidden_dim, dense=dense)


def dense_lstm_reference(inputs, params, *, hidden_dim, dense=False):
    """Pure-JAX f32 reference mirroring the PyTorch forward.  inputs: (T, B, D)."""
    H = hidden_dim
    w_ih, w_hh = params["w_ih"], params["w_hh"]
    b = params["b_ih"] + params["b_hh"]
    Bsz = inputs.shape[1]

    def step(carry, x_t):
        h, c = carry
        gates = x_t @ w_ih.T + h @ w_hh.T + b              # (B, 4H)
        i = jax.nn.sigmoid(gates[:, 0:H])
        f = jax.nn.sigmoid(gates[:, H:2 * H])
        g = jnp.tanh(gates[:, 2 * H:3 * H])
        o = jax.nn.sigmoid(gates[:, 3 * H:4 * H])
        c = f * c + i * g
        h = o * jnp.tanh(c)
        return (h, c), h

    h0 = jnp.zeros((Bsz, H), jnp.float32)
    (_, _), hs = lax.scan(step, (h0, h0), inputs)          # (T, B, H)
    out = jnp.maximum(hs, 0.0)
    if dense:
        out = jnp.maximum(out @ params["w_lin"].T + params["b_lin"], 0.0)
    return out @ params["w_fin"].T + params["b_fin"]       # (T, B, 1)


if __name__ == "__main__":
    # Small shapes consistent with the module: seq=8, input_dim=4, hidden_dim=32.
    T, INPUT_DIM, HIDDEN_DIM = 8, 4, 32
    key = jax.random.PRNGKey(0)
    k_x, k_xb, k_xl, k_p = jax.random.split(key, 4)
    params = init_params(k_p, INPUT_DIM, HIDDEN_DIM)

    def check(out, ref, tol):
        err = float(np.max(np.abs(np.asarray(out) - np.asarray(ref))))
        assert err < tol, f"max abs error {err} >= {tol}"

    # 1) Module-equivalent single sequence (batch of 1), dense in {False, True}.
    x = jax.random.normal(k_x, (T, INPUT_DIM), jnp.float32)
    for dense in (False, True):
        out = jax.block_until_ready(
            dense_lstm_forward(x, params, hidden_dim=HIDDEN_DIM, dense=dense))
        assert out.shape == (T, 1, 1), out.shape
        ref = dense_lstm_reference(x[:, None, :], params,
                                   hidden_dim=HIDDEN_DIM, dense=dense)
        check(out, ref, 3e-2)   # bf16 recurrent matmul vs f32 reference (R1)

    # 2) Batched sequences (R3/R4): B=16 -> two batch blocks on the parallel axis.
    xb = jax.random.normal(k_xb, (T, 16, INPUT_DIM), jnp.float32)
    outb = jax.block_until_ready(
        dense_lstm_forward_batched(xb, params, hidden_dim=HIDDEN_DIM, dense=False))
    assert outb.shape == (T, 16, 1), outb.shape
    check(outb, dense_lstm_reference(xb, params, hidden_dim=HIDDEN_DIM), 3e-2)

    # 3) Long sequence (R7): T=96 > 64 exercises the fori_loop path.
    xl = jax.random.normal(k_xl, (96, 4, INPUT_DIM), jnp.float32)
    outl = jax.block_until_ready(
        dense_lstm_forward_batched(xl, params, hidden_dim=HIDDEN_DIM, dense=False))
    assert outl.shape == (96, 4, 1), outl.shape
    check(outl, dense_lstm_reference(xl, params, hidden_dim=HIDDEN_DIM), 8e-2)

    print("KERNEL_OK")
</pallas_src>

<mosaic_0001>
module attributes {stable_mosaic.version = 11 : i64} {
  func.func @kernel(%arg0: i32, %arg1: memref<8x1x4xf32, #tpu.memory_space<vmem>>, %arg2: memref<4x4x32xf32, #tpu.memory_space<vmem>>, %arg3: memref<4x32x32xbf16, #tpu.memory_space<vmem>>, %arg4: memref<4x1x32xf32, #tpu.memory_space<vmem>>, %arg5: memref<1x32xf32, #tpu.memory_space<vmem>>, %arg6: memref<1x1xf32, #tpu.memory_space<vmem>>, %arg7: memref<8x1x1xf32, #tpu.memory_space<vmem>>) attributes {dimension_semantics = [#tpu.dimension_semantics<parallel>], iteration_bounds = array<i64: 1>, scalar_prefetch = 0 : i64, scratch_operands = 0 : i64, tpu.core_type = #tpu.core_type<tc>, window_params = [{transform_indices = @transform_0, window_bounds = array<i64: 8, 1, 4>}, {pipeline_mode = #tpu.pipeline_mode<synchronous>, transform_indices = @transform_1, window_bounds = array<i64: 4, 4, 32>}, {pipeline_mode = #tpu.pipeline_mode<synchronous>, transform_indices = @transform_2, window_bounds = array<i64: 4, 32, 32>}, {pipeline_mode = #tpu.pipeline_mode<synchronous>, transform_indices = @transform_3, window_bounds = array<i64: 4, 1, 32>}, {pipeline_mode = #tpu.pipeline_mode<synchronous>, transform_indices = @transform_4, window_bounds = array<i64: 1, 32>}, {pipeline_mode = #tpu.pipeline_mode<synchronous>, transform_indices = @transform_5, window_bounds = array<i64: 1, 1>}, {transform_indices = @transform_6, window_bounds = array<i64: 8, 1, 1>}]} {
    %c0 = arith.constant 0 : index
    %c0_0 = arith.constant 0 : index
    %c0_1 = arith.constant 0 : index
    %0 = vector.load %arg2[%c0, %c0_0, %c0_1] : memref<4x4x32xf32, #tpu.memory_space<vmem>>, vector<1x4x32xf32>
    %1 = vector.shape_cast %0 : vector<1x4x32xf32> to vector<4x32xf32>
    %c1 = arith.constant 1 : index
    %c0_2 = arith.constant 0 : index
    %c0_3 = arith.constant 0 : index
    %2 = vector.load %arg2[%c1, %c0_2, %c0_3] : memref<4x4x32xf32, #tpu.memory_space<vmem>>, vector<1x4x32xf32>
    %3 = vector.shape_cast %2 : vector<1x4x32xf32> to vector<4x32xf32>
    %c2 = arith.constant 2 : index
    %c0_4 = arith.constant 0 : index
    %c0_5 = arith.constant 0 : index
    %4 = vector.load %arg2[%c2, %c0_4, %c0_5] : memref<4x4x32xf32, #tpu.memory_space<vmem>>, vector<1x4x32xf32>
    %5 = vector.shape_cast %4 : vector<1x4x32xf32> to vector<4x32xf32>
    %c3 = arith.constant 3 : index
    %c0_6 = arith.constant 0 : index
    %c0_7 = arith.constant 0 : index
    %6 = vector.load %arg2[%c3, %c0_6, %c0_7] : memref<4x4x32xf32, #tpu.memory_space<vmem>>, vector<1x4x32xf32>
    %7 = vector.shape_cast %6 : vector<1x4x32xf32> to vector<4x32xf32>
    %c0_8 = arith.constant 0 : index
    %c0_9 = arith.constant 0 : index
    %c0_10 = arith.constant 0 : index
    %8 = vector.load %arg3[%c0_8, %c0_9, %c0_10] : memref<4x32x32xbf16, #tpu.memory_space<vmem>>, vector<1x32x32xbf16>
    %9 = vector.shape_cast %8 : vector<1x32x32xbf16> to vector<32x32xbf16>
    %c1_11 = arith.constant 1 : index
    %c0_12 = arith.constant 0 : index
    %c0_13 = arith.constant 0 : index
    %10 = vector.load %arg3[%c1_11, %c0_12, %c0_13] : memref<4x32x32xbf16, #tpu.memory_space<vmem>>, vector<1x32x32xbf16>
    %11 = vector.shape_cast %10 : vector<1x32x32xbf16> to vector<32x32xbf16>
    %c2_14 = arith.constant 2 : index
    %c0_15 = arith.constant 0 : index
    %c0_16 = arith.constant 0 : index
    %12 = vector.load %arg3[%c2_14, %c0_15, %c0_16] : memref<4x32x32xbf16, #tpu.memory_space<vmem>>, vector<1x32x32xbf16>
    %13 = vector.shape_cast %12 : vector<1x32x32xbf16> to vector<32x32xbf16>
    %c3_17 = arith.constant 3 : index
    %c0_18 = arith.constant 0 : index
    %c0_19 = arith.constant 0 : index
    %14 = vector.load %arg3[%c3_17, %c0_18, %c0_19] : memref<4x32x32xbf16, #tpu.memory_space<vmem>>, vector<1x32x32xbf16>
    %15 = vector.shape_cast %14 : vector<1x32x32xbf16> to vector<32x32xbf16>
    %c0_20 = arith.constant 0 : index
    %c0_21 = arith.constant 0 : index
    %c0_22 = arith.constant 0 : index
    %16 = vector.load %arg4[%c0_20, %c0_21, %c0_22] : memref<4x1x32xf32, #tpu.memory_space<vmem>>, vector<1x1x32xf32>
    %17 = vector.shape_cast %16 : vector<1x1x32xf32> to vector<1x32xf32>
    %c1_23 = arith.constant 1 : index
    %c0_24 = arith.constant 0 : index
    %c0_25 = arith.constant 0 : index
    %18 = vector.load %arg4[%c1_23, %c0_24, %c0_25] : memref<4x1x32xf32, #tpu.memory_space<vmem>>, vector<1x1x32xf32>
    %19 = vector.shape_cast %18 : vector<1x1x32xf32> to vector<1x32xf32>
    %c2_26 = arith.constant 2 : index
    %c0_27 = arith.constant 0 : index
    %c0_28 = arith.constant 0 : index
    %20 = vector.load %arg4[%c2_26, %c0_27, %c0_28] : memref<4x1x32xf32, #tpu.memory_space<vmem>>, vector<1x1x32xf32>
    %21 = vector.shape_cast %20 : vector<1x1x32xf32> to vector<1x32xf32>
    %c3_29 = arith.constant 3 : index
    %c0_30 = arith.constant 0 : index
    %c0_31 = arith.constant 0 : index
    %22 = vector.load %arg4[%c3_29, %c0_30, %c0_31] : memref<4x1x32xf32, #tpu.memory_space<vmem>>, vector<1x1x32xf32>
    %23 = vector.shape_cast %22 : vector<1x1x32xf32> to vector<1x32xf32>
    %c0_32 = arith.constant 0 : index
    %c0_33 = arith.constant 0 : index
    %24 = vector.load %arg5[%c0_32, %c0_33] : memref<1x32xf32, #tpu.memory_space<vmem>>, vector<1x32xf32>
    %c0_34 = arith.constant 0 : index
    %c0_35 = arith.constant 0 : index
    %25 = vector.load %arg6[%c0_34, %c0_35] : memref<1x1xf32, #tpu.memory_space<vmem>>, vector<1x1xf32>
    %cst = arith.constant 0.000000e+00 : f32
    %26 = vector.broadcast %cst : f32 to vector<1x32xf32>
    %cst_36 = arith.constant 0.000000e+00 : f32
    %27 = vector.broadcast %cst_36 : f32 to vector<1x32xf32>
    %c0_37 = arith.constant 0 : index
    %c0_38 = arith.constant 0 : index
    %c0_39 = arith.constant 0 : index
    %28 = vector.load %arg1[%c0_37, %c0_38, %c0_39] : memref<8x1x4xf32, #tpu.memory_space<vmem>>, vector<1x1x4xf32>
    %29 = vector.shape_cast %28 : vector<1x1x4xf32> to vector<1x4xf32>
    %30 = arith.truncf %26 : vector<1x32xf32> to vector<1x32xbf16>
    %cst_40 = arith.constant dense<0.000000e+00> : vector<1x32xf32>
    %31 = tpu.matmul %29, %1, %cst_40 {dimension_numbers = #tpu.dot_dimension_numbers<[1], [0], [0], [1], [0, 0, 1, 1], [], []>} : vector<1x4xf32>, vector<4x32xf32>, vector<1x32xf32> -> vector<1x32xf32>
    %cst_41 = arith.constant dense<0.000000e+00> : vector<1x32xf32>
    %32 = tpu.matmul %30, %9, %cst_41 {dimension_numbers = #tpu.dot_dimension_numbers<[1], [0], [0], [1], [0, 0, 1, 1], [], []>} : vector<1x32xbf16>, vector<32x32xbf16>, vector<1x32xf32> -> vector<1x32xf32>
    %33 = arith.addf %31, %32 : vector<1x32xf32>
    %34 = arith.addf %33, %17 : vector<1x32xf32>
    %cst_42 = arith.constant dense<0.000000e+00> : vector<1x32xf32>
    %35 = tpu.matmul %29, %3, %cst_42 {dimension_numbers = #tpu.dot_dimension_numbers<[1], [0], [0], [1], [0, 0, 1, 1], [], []>} : vector<1x4xf32>, vector<4x32xf32>, vector<1x32xf32> -> vector<1x32xf32>
    %cst_43 = arith.constant dense<0.000000e+00> : vector<1x32xf32>
    %36 = tpu.matmul %30, %11, %cst_43 {dimension_numbers = #tpu.dot_dimension_numbers<[1], [0], [0], [1], [0, 0, 1, 1], [], []>} : vector<1x32xbf16>, vector<32x32xbf16>, vector<1x32xf32> -> vector<1x32xf32>
    %37 = arith.addf %35, %36 : vector<1x32xf32>
    %38 = arith.addf %37, %19 : vector<1x32xf32>
    %cst_44 = arith.constant dense<0.000000e+00> : vector<1x32xf32>
    %39 = tpu.matmul %29, %5, %cst_44 {dimension_numbers = #tpu.dot_dimension_numbers<[1], [0], [0], [1], [0, 0, 1, 1], [], []>} : vector<1x4xf32>, vector<4x32xf32>, vector<1x32xf32> -> vector<1x32xf32>
    %cst_45 = arith.constant dense<0.000000e+00> : vector<1x32xf32>
    %40 = tpu.matmul %30, %13, %cst_45 {dimension_numbers = #tpu.dot_dimension_numbers<[1], [0], [0], [1], [0, 0, 1, 1], [], []>} : vector<1x32xbf16>, vector<32x32xbf16>, vector<1x32xf32> -> vector<1x32xf32>
    %41 = arith.addf %39, %40 : vector<1x32xf32>
    %42 = arith.addf %41, %21 : vector<1x32xf32>
    %cst_46 = arith.constant dense<0.000000e+00> : vector<1x32xf32>
    %43 = tpu.matmul %29, %7, %cst_46 {dimension_numbers = #tpu.dot_dimension_numbers<[1], [0], [0], [1], [0, 0, 1, 1], [], []>} : vector<1x4xf32>, vector<4x32xf32>, vector<1x32xf32> -> vector<1x32xf32>
    %cst_47 = arith.constant dense<0.000000e+00> : vector<1x32xf32>
    %44 = tpu.matmul %30, %15, %cst_47 {dimension_numbers = #tpu.dot_dimension_numbers<[1], [0], [0], [1], [0, 0, 1, 1], [], []>} : vector<1x32xbf16>, vector<32x32xbf16>, vector<1x32xf32> -> vector<1x32xf32>
    %45 = arith.addf %43, %44 : vector<1x32xf32>
    %46 = arith.addf %45, %23 : vector<1x32xf32>
    %47 = arith.negf %34 : vector<1x32xf32>
    %48 = math.exp %47 : vector<1x32xf32>
    %cst_48 = arith.constant 1.000000e+00 : f32
    %49 = vector.broadcast %cst_48 : f32 to vector<1x32xf32>
    %50 = arith.addf %49, %48 : vector<1x32xf32>
    %51 = arith.divf %49, %50 : vector<1x32xf32>
    %52 = arith.negf %38 : vector<1x32xf32>
    %53 = math.exp %52 : vector<1x32xf32>
    %cst_49 = arith.constant 1.000000e+00 : f32
    %54 = vector.broadcast %cst_49 : f32 to vector<1x32xf32>
    %55 = arith.addf %54, %53 : vector<1x32xf32>
    %56 = arith.divf %54, %55 : vector<1x32xf32>
    %57 = math.tanh %42 : vector<1x32xf32>
    %58 = arith.negf %46 : vector<1x32xf32>
    %59 = math.exp %58 : vector<1x32xf32>
    %cst_50 = arith.constant 1.000000e+00 : f32
    %60 = vector.broadcast %cst_50 : f32 to vector<1x32xf32>
    %61 = arith.addf %60, %59 : vector<1x32xf32>
    %62 = arith.divf %60, %61 : vector<1x32xf32>
    %63 = arith.mulf %56, %27 : vector<1x32xf32>
    %64 = arith.mulf %51, %57 : vector<1x32xf32>
    %65 = arith.addf %63, %64 : vector<1x32xf32>
    %66 = math.tanh %65 : vector<1x32xf32>
    %67 = arith.mulf %62, %66 : vector<1x32xf32>
    %cst_51 = arith.constant 0.000000e+00 : f32
    %68 = vector.broadcast %cst_51 : f32 to vector<1x32xf32>
    %69 = arith.maximumf %67, %68 : vector<1x32xf32>
    %70 = arith.mulf %69, %24 : vector<1x32xf32>
    %cst_52 = arith.constant dense<0.000000e+00> : vector<1xf32>
    %71 = vector.multi_reduction <add>, %70, %cst_52 [1] : vector<1x32xf32> to vector<1xf32>
    %72 = vector.shape_cast %71 : vector<1xf32> to vector<1x1xf32>
    %73 = arith.addf %72, %25 : vector<1x1xf32>
    %74 = vector.shape_cast %73 : vector<1x1xf32> to vector<1x1x1xf32>
    %c1_53 = arith.constant 1 : index
    %c0_54 = arith.constant 0 : index
    %c0_55 = arith.constant 0 : index
    %75 = vector.load %arg1[%c1_53, %c0_54, %c0_55] : memref<8x1x4xf32, #tpu.memory_space<vmem>>, vector<1x1x4xf32>
    %76 = vector.shape_cast %75 : vector<1x1x4xf32> to vector<1x4xf32>
    %77 = arith.truncf %67 : vector<1x32xf32> to vector<1x32xbf16>
    %cst_56 = arith.constant dense<0.000000e+00> : vector<1x32xf32>
    %78 = tpu.matmul %76, %1, %cst_56 {dimension_numbers = #tpu.dot_dimension_numbers<[1], [0], [0], [1], [0, 0, 1, 1], [], []>} : vector<1x4xf32>, vector<4x32xf32>, vector<1x32xf32> -> vector<1x32xf32>
    %cst_57 = arith.constant dense<0.000000e+00> : vector<1x32xf32>
    %79 = tpu.matmul %77, %9, %cst_57 {dimension_numbers = #tpu.dot_dimension_numbers<[1], [0], [0], [1], [0, 0, 1, 1], [], []>} : vector<1x32xbf16>, vector<32x32xbf16>, vector<1x32xf32> -> vector<1x32xf32>
    %80 = arith.addf %78, %79 : vector<1x32xf32>
    %81 = arith.addf %80, %17 : vector<1x32xf32>
    %cst_58 = arith.constant dense<0.000000e+00> : vector<1x32xf32>
    %82 = tpu.matmul %76, %3, %cst_58 {dimension_numbers = #tpu.dot_dimension_numbers<[1], [0], [0], [1], [0, 0, 1, 1], [], []>} : vector<1x4xf32>, vector<4x32xf32>, vector<1x32xf32> -> vector<1x32xf32>
    %cst_59 = arith.constant dense<0.000000e+00> : vector<1x32xf32>
    %83 = tpu.matmul %77, %11, %cst_59 {dimension_numbers = #tpu.dot_dimension_numbers<[1], [0], [0], [1], [0, 0, 1, 1], [], []>} : vector<1x32xbf16>, vector<32x32xbf16>, vector<1x32xf32> -> vector<1x32xf32>
    %84 = arith.addf %82, %83 : vector<1x32xf32>
    %85 = arith.addf %84, %19 : vector<1x32xf32>
    %cst_60 = arith.constant dense<0.000000e+00> : vector<1x32xf32>
    %86 = tpu.matmul %76, %5, %cst_60 {dimension_numbers = #tpu.dot_dimension_numbers<[1], [0], [0], [1], [0, 0, 1, 1], [], []>} : vector<1x4xf32>, vector<4x32xf32>, vector<1x32xf32> -> vector<1x32xf32>
    %cst_61 = arith.constant dense<0.000000e+00> : vector<1x32xf32>
    %87 = tpu.matmul %77, %13, %cst_61 {dimension_numbers = #tpu.dot_dimension_numbers<[1], [0], [0], [1], [0, 0, 1, 1], [], []>} : vector<1x32xbf16>, vector<32x32xbf16>, vector<1x32xf32> -> vector<1x32xf32>
    %88 = arith.addf %86, %87 : vector<1x32xf32>
    %89 = arith.addf %88, %21 : vector<1x32xf32>
    %cst_62 = arith.constant dense<0.000000e+00> : vector<1x32xf32>
    %90 = tpu.matmul %76, %7, %cst_62 {dimension_numbers = #tpu.dot_dimension_numbers<[1], [0], [0], [1], [0, 0, 1, 1], [], []>} : vector<1x4xf32>, vector<4x32xf32>, vector<1x32xf32> -> vector<1x32xf32>
    %cst_63 = arith.constant dense<0.000000e+00> : vector<1x32xf32>
    %91 = tpu.matmul %77, %15, %cst_63 {dimension_numbers = #tpu.dot_dimension_numbers<[1], [0], [0], [1], [0, 0, 1, 1], [], []>} : vector<1x32xbf16>, vector<32x32xbf16>, vector<1x32xf32> -> vector<1x32xf32>
    %92 = arith.addf %90, %91 : vector<1x32xf32>
    %93 = arith.addf %92, %23 : vector<1x32xf32>
    %94 = arith.negf %81 : vector<1x32xf32>
    %95 = math.exp %94 : vector<1x32xf32>
    %cst_64 = arith.constant 1.000000e+00 : f32
    %96 = vector.broadcast %cst_64 : f32 to vector<1x32xf32>
    %97 = arith.addf %96, %95 : vector<1x32xf32>
    %98 = arith.divf %96, %97 : vector<1x32xf32>
    %99 = arith.negf %85 : vector<1x32xf32>
    %100 = math.exp %99 : vector<1x32xf32>
    %cst_65 = arith.constant 1.000000e+00 : f32
    %101 = vector.broadcast %cst_65 : f32 to vector<1x32xf32>
    %102 = arith.addf %101, %100 : vector<1x32xf32>
    %103 = arith.divf %101, %102 : vector<1x32xf32>
    %104 = math.tanh %89 : vector<1x32xf32>
    %105 = arith.negf %93 : vector<1x32xf32>
    %106 = math.exp %105 : vector<1x32xf32>
    %cst_66 = arith.constant 1.000000e+00 : f32
    %107 = vector.broadcast %cst_66 : f32 to vector<1x32xf32>
    %108 = arith.addf %107, %106 : vector<1x32xf32>
    %109 = arith.divf %107, %108 : vector<1x32xf32>
    %110 = arith.mulf %103, %65 : vector<1x32xf32>
    %111 = arith.mulf %98, %104 : vector<1x32xf32>
    %112 = arith.addf %110, %111 : vector<1x32xf32>
    %113 = math.tanh %112 : vector<1x32xf32>
    %114 = arith.mulf %109, %113 : vector<1x32xf32>
    %cst_67 = arith.constant 0.000000e+00 : f32
    %115 = vector.broadcast %cst_67 : f32 to vector<1x32xf32>
    %116 = arith.maximumf %114, %115 : vector<1x32xf32>
    %117 = arith.mulf %116, %24 : vector<1x32xf32>
    %cst_68 = arith.constant dense<0.000000e+00> : vector<1xf32>
    %118 = vector.multi_reduction <add>, %117, %cst_68 [1] : vector<1x32xf32> to vector<1xf32>
    %119 = vector.shape_cast %118 : vector<1xf32> to vector<1x1xf32>
    %120 = arith.addf %119, %25 : vector<1x1xf32>
    %121 = vector.shape_cast %120 : vector<1x1xf32> to vector<1x1x1xf32>
    %c2_69 = arith.constant 2 : index
    %c0_70 = arith.constant 0 : index
    %c0_71 = arith.constant 0 : index
    %122 = vector.load %arg1[%c2_69, %c0_70, %c0_71] : memref<8x1x4xf32, #tpu.memory_space<vmem>>, vector<1x1x4xf32>
    %123 = vector.shape_cast %122 : vector<1x1x4xf32> to vector<1x4xf32>
    %124 = arith.truncf %114 : vector<1x32xf32> to vector<1x32xbf16>
    %cst_72 = arith.constant dense<0.000000e+00> : vector<1x32xf32>
    %125 = tpu.matmul %123, %1, %cst_72 {dimension_numbers = #tpu.dot_dimension_numbers<[1], [0], [0], [1], [0, 0, 1, 1], [], []>} : vector<1x4xf32>, vector<4x32xf32>, vector<1x32xf32> -> vector<1x32xf32>
    %cst_73 = arith.constant dense<0.000000e+00> : vector<1x32xf32>
    %126 = tpu.matmul %124, %9, %cst_73 {dimension_numbers = #tpu.dot_dimension_numbers<[1], [0], [0], [1], [0, 0, 1, 1], [], []>} : vector<1x32xbf16>, vector<32x32xbf16>, vector<1x32xf32> -> vector<1x32xf32>
    %127 = arith.addf %125, %126 : vector<1x32xf32>
    %128 = arith.addf %127, %17 : vector<1x32xf32>
    %cst_74 = arith.constant dense<0.000000e+00> : vector<1x32xf32>
    %129 = tpu.matmul %123, %3, %cst_74 {dimension_numbers = #tpu.dot_dimension_numbers<[1], [0], [0], [1], [0, 0, 1, 1], [], []>} : vector<1x4xf32>, vector<4x32xf32>, vector<1x32xf32> -> vector<1x32xf32>
    %cst_75 = arith.constant dense<0.000000e+00> : vector<1x32xf32>
    %130 = tpu.matmul %124, %11, %cst_75 {dimension_numbers = #tpu.dot_dimension_numbers<[1], [0], [0], [1], [0, 0, 1, 1], [], []>} : vector<1x32xbf16>, vector<32x32xbf16>, vector<1x32xf32> -> vector<1x32xf32>
    %131 = arith.addf %129, %130 : vector<1x32xf32>
    %132 = arith.addf %131, %19 : vector<1x32xf32>
    %cst_76 = arith.constant dense<0.000000e+00> : vector<1x32xf32>
    %133 = tpu.matmul %123, %5, %cst_76 {dimension_numbers = #tpu.dot_dimension_numbers<[1], [0], [0], [1], [0, 0, 1, 1], [], []>} : vector<1x4xf32>, vector<4x32xf32>, vector<1x32xf32> -> vector<1x32xf32>
    %cst_77 = arith.constant dense<0.000000e+00> : vector<1x32xf32>
    %134 = tpu.matmul %124, %13, %cst_77 {dimension_numbers = #tpu.dot_dimension_numbers<[1], [0], [0], [1], [0, 0, 1, 1], [], []>} : vector<1x32xbf16>, vector<32x32xbf16>, vector<1x32xf32> -> vector<1x32xf32>
    %135 = arith.addf %133, %134 : vector<1x32xf32>
    %136 = arith.addf %135, %21 : vector<1x32xf32>
    %cst_78 = arith.constant dense<0.000000e+00> : vector<1x32xf32>
    %137 = tpu.matmul %123, %7, %cst_78 {dimension_numbers = #tpu.dot_dimension_numbers<[1], [0], [0], [1], [0, 0, 1, 1], [], []>} : vector<1x4xf32>, vector<4x32xf32>, vector<1x32xf32> -> vector<1x32xf32>
    %cst_79 = arith.constant dense<0.000000e+00> : vector<1x32xf32>
    %138 = tpu.matmul %124, %15, %cst_79 {dimension_numbers = #tpu.dot_dimension_numbers<[1], [0], [0], [1], [0, 0, 1, 1], [], []>} : vector<1x32xbf16>, vector<32x32xbf16>, vector<1x32xf32> -> vector<1x32xf32>
    %139 = arith.addf %137, %138 : vector<1x32xf32>
    %140 = arith.addf %139, %23 : vector<1x32xf32>
    %141 = arith.negf %128 : vector<1x32xf32>
    %142 = math.exp %141 : vector<1x32xf32>
    %cst_80 = arith.constant 1.000000e+00 : f32
    %143 = vector.broadcast %cst_80 : f32 to vector<1x32xf32>
    %144 = arith.addf %143, %142 : vector<1x32xf32>
    %145 = arith.divf %143, %144 : vector<1x32xf32>
    %146 = arith.negf %132 : vector<1x32xf32>
    %147 = math.exp %146 : vector<1x32xf32>
    %cst_81 = arith.constant 1.000000e+00 : f32
    %148 = vector.broadcast %cst_81 : f32 to vector<1x32xf32>
    %149 = arith.addf %148, %147 : vector<1x32xf32>
    %150 = arith.divf %148, %149 : vector<1x32xf32>
    %151 = math.tanh %136 : vector<1x32xf32>
    %152 = arith.negf %140 : vector<1x32xf32>
    %153 = math.exp %152 : vector<1x32xf32>
    %cst_82 = arith.constant 1.000000e+00 : f32
    %154 = vector.broadcast %cst_82 : f32 to vector<1x32xf32>
    %155 = arith.addf %154, %153 : vector<1x32xf32>
    %156 = arith.divf %154, %155 : vector<1x32xf32>
    %157 = arith.mulf %150, %112 : vector<1x32xf32>
    %158 = arith.mulf %145, %151 : vector<1x32xf32>
    %159 = arith.addf %157, %158 : vector<1x32xf32>
    %160 = math.tanh %159 : vector<1x32xf32>
    %161 = arith.mulf %156, %160 : vector<1x32xf32>
    %cst_83 = arith.constant 0.000000e+00 : f32
    %162 = vector.broadcast %cst_83 : f32 to vector<1x32xf32>
    %163 = arith.maximumf %161, %162 : vector<1x32xf32>
    %164 = arith.mulf %163, %24 : vector<1x32xf32>
    %cst_84 = arith.constant dense<0.000000e+00> : vector<1xf32>
    %165 = vector.multi_reduction <add>, %164, %cst_84 [1] : vector<1x32xf32> to vector<1xf32>
    %166 = vector.shape_cast %165 : vector<1xf32> to vector<1x1xf32>
    %167 = arith.addf %166, %25 : vector<1x1xf32>
    %168 = vector.shape_cast %167 : vector<1x1xf32> to vector<1x1x1xf32>
    %c3_85 = arith.constant 3 : index
    %c0_86 = arith.constant 0 : index
    %c0_87 = arith.constant 0 : index
    %169 = vector.load %arg1[%c3_85, %c0_86, %c0_87] : memref<8x1x4xf32, #tpu.memory_space<vmem>>, vector<1x1x4xf32>
    %170 = vector.shape_cast %169 : vector<1x1x4xf32> to vector<1x4xf32>
    %171 = arith.truncf %161 : vector<1x32xf32> to vector<1x32xbf16>
    %cst_88 = arith.constant dense<0.000000e+00> : vector<1x32xf32>
    %172 = tpu.matmul %170, %1, %cst_88 {dimension_numbers = #tpu.dot_dimension_numbers<[1], [0], [0], [1], [0, 0, 1, 1], [], []>} : vector<1x4xf32>, vector<4x32xf32>, vector<1x32xf32> -> vector<1x32xf32>
    %cst_89 = arith.constant dense<0.000000e+00> : vector<1x32xf32>
    %173 = tpu.matmul %171, %9, %cst_89 {dimension_numbers = #tpu.dot_dimension_numbers<[1], [0], [0], [1], [0, 0, 1, 1], [], []>} : vector<1x32xbf16>, vector<32x32xbf16>, vector<1x32xf32> -> vector<1x32xf32>
    %174 = arith.addf %172, %173 : vector<1x32xf32>
    %175 = arith.addf %174, %17 : vector<1x32xf32>
    %cst_90 = arith.constant dense<0.000000e+00> : vector<1x32xf32>
    %176 = tpu.matmul %170, %3, %cst_90 {dimension_numbers = #tpu.dot_dimension_numbers<[1], [0], [0], [1], [0, 0, 1, 1], [], []>} : vector<1x4xf32>, vector<4x32xf32>, vector<1x32xf32> -> vector<1x32xf32>
    %cst_91 = arith.constant dense<0.000000e+00> : vector<1x32xf32>
    %177 = tpu.matmul %171, %11, %cst_91 {dimension_numbers = #tpu.dot_dimension_numbers<[1], [0], [0], [1], [0, 0, 1, 1], [], []>} : vector<1x32xbf16>, vector<32x32xbf16>, vector<1x32xf32> -> vector<1x32xf32>
    %178 = arith.addf %176, %177 : vector<1x32xf32>
    %179 = arith.addf %178, %19 : vector<1x32xf32>
    %cst_92 = arith.constant dense<0.000000e+00> : vector<1x32xf32>
    %180 = tpu.matmul %170, %5, %cst_92 {dimension_numbers = #tpu.dot_dimension_numbers<[1], [0], [0], [1], [0, 0, 1, 1], [], []>} : vector<1x4xf32>, vector<4x32xf32>, vector<1x32xf32> -> vector<1x32xf32>
    %cst_93 = arith.constant dense<0.000000e+00> : vector<1x32xf32>
    %181 = tpu.matmul %171, %13, %cst_93 {dimension_numbers = #tpu.dot_dimension_numbers<[1], [0], [0], [1], [0, 0, 1, 1], [], []>} : vector<1x32xbf16>, vector<32x32xbf16>, vector<1x32xf32> -> vector<1x32xf32>
    %182 = arith.addf %180, %181 : vector<1x32xf32>
    %183 = arith.addf %182, %21 : vector<1x32xf32>
    %cst_94 = arith.constant dense<0.000000e+00> : vector<1x32xf32>
    %184 = tpu.matmul %170, %7, %cst_94 {dimension_numbers = #tpu.dot_dimension_numbers<[1], [0], [0], [1], [0, 0, 1, 1], [], []>} : vector<1x4xf32>, vector<4x32xf32>, vector<1x32xf32> -> vector<1x32xf32>
    %cst_95 = arith.constant dense<0.000000e+00> : vector<1x32xf32>
    %185 = tpu.matmul %171, %15, %cst_95 {dimension_numbers = #tpu.dot_dimension_numbers<[1], [0], [0], [1], [0, 0, 1, 1], [], []>} : vector<1x32xbf16>, vector<32x32xbf16>, vector<1x32xf32> -> vector<1x32xf32>
    %186 = arith.addf %184, %185 : vector<1x32xf32>
    %187 = arith.addf %186, %23 : vector<1x32xf32>
    %188 = arith.negf %175 : vector<1x32xf32>
    %189 = math.exp %188 : vector<1x32xf32>
    %cst_96 = arith.constant 1.000000e+00 : f32
    %190 = vector.broadcast %cst_96 : f32 to vector<1x32xf32>
    %191 = arith.addf %190, %189 : vector<1x32xf32>
    %192 = arith.divf %190, %191 : vector<1x32xf32>
    %193 = arith.negf %179 : vector<1x32xf32>
    %194 = math.exp %193 : vector<1x32xf32>
    %cst_97 = arith.constant 1.000000e+00 : f32
    %195 = vector.broadcast %cst_97 : f32 to vector<1x32xf32>
    %196 = arith.addf %195, %194 : vector<1x32xf32>
    %197 = arith.divf %195, %196 : vector<1x32xf32>
    %198 = math.tanh %183 : vector<1x32xf32>
    %199 = arith.negf %187 : vector<1x32xf32>
    %200 = math.exp %199 : vector<1x32xf32>
    %cst_98 = arith.constant 1.000000e+00 : f32
    %201 = vector.broadcast %cst_98 : f32 to vector<1x32xf32>
    %202 = arith.addf %201, %200 : vector<1x32xf32>
    %203 = arith.divf %201, %202 : vector<1x32xf32>
    %204 = arith.mulf %197, %159 : vector<1x32xf32>
    %205 = arith.mulf %192, %198 : vector<1x32xf32>
    %206 = arith.addf %204, %205 : vector<1x32xf32>
    %207 = math.tanh %206 : vector<1x32xf32>
    %208 = arith.mulf %203, %207 : vector<1x32xf32>
    %cst_99 = arith.constant 0.000000e+00 : f32
    %209 = vector.broadcast %cst_99 : f32 to vector<1x32xf32>
    %210 = arith.maximumf %208, %209 : vector<1x32xf32>
    %211 = arith.mulf %210, %24 : vector<1x32xf32>
    %cst_100 = arith.constant dense<0.000000e+00> : vector<1xf32>
    %212 = vector.multi_reduction <add>, %211, %cst_100 [1] : vector<1x32xf32> to vector<1xf32>
    %213 = vector.shape_cast %212 : vector<1xf32> to vector<1x1xf32>
    %214 = arith.addf %213, %25 : vector<1x1xf32>
    %215 = vector.shape_cast %214 : vector<1x1xf32> to vector<1x1x1xf32>
    %c4 = arith.constant 4 : index
    %c0_101 = arith.constant 0 : index
    %c0_102 = arith.constant 0 : index
    %216 = vector.load %arg1[%c4, %c0_101, %c0_102] : memref<8x1x4xf32, #tpu.memory_space<vmem>>, vector<1x1x4xf32>
    %217 = vector.shape_cast %216 : vector<1x1x4xf32> to vector<1x4xf32>
    %218 = arith.truncf %208 : vector<1x32xf32> to vector<1x32xbf16>
    %cst_103 = arith.constant dense<0.000000e+00> : vector<1x32xf32>
    %219 = tpu.matmul %217, %1, %cst_103 {dimension_numbers = #tpu.dot_dimension_numbers<[1], [0], [0], [1], [0, 0, 1, 1], [], []>} : vector<1x4xf32>, vector<4x32xf32>, vector<1x32xf32> -> vector<1x32xf32>
    %cst_104 = arith.constant dense<0.000000e+00> : vector<1x32xf32>
    %220 = tpu.matmul %218, %9, %cst_104 {dimension_numbers = #tpu.dot_dimension_numbers<[1], [0], [0], [1], [0, 0, 1, 1], [], []>} : vector<1x32xbf16>, vector<32x32xbf16>, vector<1x32xf32> -> vector<1x32xf32>
    %221 = arith.addf %219, %220 : vector<1x32xf32>
    %222 = arith.addf %221, %17 : vector<1x32xf32>
    %cst_105 = arith.constant dense<0.000000e+00> : vector<1x32xf32>
    %223 = tpu.matmul %217, %3, %cst_105 {dimension_numbers = #tpu.dot_dimension_numbers<[1], [0], [0], [1], [0, 0, 1, 1], [], []>} : vector<1x4xf32>, vector<4x32xf32>, vector<1x32xf32> -> vector<1x32xf32>
    %cst_106 = arith.constant dense<0.000000e+00> : vector<1x32xf32>
    %224 = tpu.matmul %218, %11, %cst_106 {dimension_numbers = #tpu.dot_dimension_numbers<[1], [0], [0], [1], [0, 0, 1, 1], [], []>} : vector<1x32xbf16>, vector<32x32xbf16>, vector<1x32xf32> -> vector<1x32xf32>
    %225 = arith.addf %223, %224 : vector<1x32xf32>
    %226 = arith.addf %225, %19 : vector<1x32xf32>
    %cst_107 = arith.constant dense<0.000000e+00> : vector<1x32xf32>
    %227 = tpu.matmul %217, %5, %cst_107 {dimension_numbers = #tpu.dot_dimension_numbers<[1], [0], [0], [1], [0, 0, 1, 1], [], []>} : vector<1x4xf32>, vector<4x32xf32>, vector<1x32xf32> -> vector<1x32xf32>
    %cst_108 = arith.constant dense<0.000000e+00> : vector<1x32xf32>
    %228 = tpu.matmul %218, %13, %cst_108 {dimension_numbers = #tpu.dot_dimension_numbers<[1], [0], [0], [1], [0, 0, 1, 1], [], []>} : vector<1x32xbf16>, vector<32x32xbf16>, vector<1x32xf32> -> vector<1x32xf32>
    %229 = arith.addf %227, %228 : vector<1x32xf32>
    %230 = arith.addf %229, %21 : vector<1x32xf32>
    %cst_109 = arith.constant dense<0.000000e+00> : vector<1x32xf32>
    %231 = tpu.matmul %217, %7, %cst_109 {dimension_numbers = #tpu.dot_dimension_numbers<[1], [0], [0], [1], [0, 0, 1, 1], [], []>} : vector<1x4xf32>, vector<4x32xf32>, vector<1x32xf32> -> vector<1x32xf32>
    %cst_110 = arith.constant dense<0.000000e+00> : vector<1x32xf32>
    %232 = tpu.matmul %218, %15, %cst_110 {dimension_numbers = #tpu.dot_dimension_numbers<[1], [0], [0], [1], [0, 0, 1, 1], [], []>} : vector<1x32xbf16>, vector<32x32xbf16>, vector<1x32xf32> -> vector<1x32xf32>
    %233 = arith.addf %231, %232 : vector<1x32xf32>
    %234 = arith.addf %233, %23 : vector<1x32xf32>
    %235 = arith.negf %222 : vector<1x32xf32>
    %236 = math.exp %235 : vector<1x32xf32>
    %cst_111 = arith.constant 1.000000e+00 : f32
    %237 = vector.broadcast %cst_111 : f32 to vector<1x32xf32>
    %238 = arith.addf %237, %236 : vector<1x32xf32>
    %239 = arith.divf %237, %238 : vector<1x32xf32>
    %240 = arith.negf %226 : vector<1x32xf32>
    %241 = math.exp %240 : vector<1x32xf32>
    %cst_112 = arith.constant 1.000000e+00 : f32
    %242 = vector.broadcast %cst_112 : f32 to vector<1x32xf32>
    %243 = arith.addf %242, %241 : vector<1x32xf32>
    %244 = arith.divf %242, %243 : vector<1x32xf32>
    %245 = math.tanh %230 : vector<1x32xf32>
    %246 = arith.negf %234 : vector<1x32xf32>
    %247 = math.exp %246 : vector<1x32xf32>
    %cst_113 = arith.constant 1.000000e+00 : f32
    %248 = vector.broadcast %cst_113 : f32 to vector<1x32xf32>
    %249 = arith.addf %248, %247 : vector<1x32xf32>
    %250 = arith.divf %248, %249 : vector<1x32xf32>
    %251 = arith.mulf %244, %206 : vector<1x32xf32>
    %252 = arith.mulf %239, %245 : vector<1x32xf32>
    %253 = arith.addf %251, %252 : vector<1x32xf32>
    %254 = math.tanh %253 : vector<1x32xf32>
    %255 = arith.mulf %250, %254 : vector<1x32xf32>
    %cst_114 = arith.constant 0.000000e+00 : f32
    %256 = vector.broadcast %cst_114 : f32 to vector<1x32xf32>
    %257 = arith.maximumf %255, %256 : vector<1x32xf32>
    %258 = arith.mulf %257, %24 : vector<1x32xf32>
    %cst_115 = arith.constant dense<0.000000e+00> : vector<1xf32>
    %259 = vector.multi_reduction <add>, %258, %cst_115 [1] : vector<1x32xf32> to vector<1xf32>
    %260 = vector.shape_cast %259 : vector<1xf32> to vector<1x1xf32>
    %261 = arith.addf %260, %25 : vector<1x1xf32>
    %262 = vector.shape_cast %261 : vector<1x1xf32> to vector<1x1x1xf32>
    %c5 = arith.constant 5 : index
    %c0_116 = arith.constant 0 : index
    %c0_117 = arith.constant 0 : index
    %263 = vector.load %arg1[%c5, %c0_116, %c0_117] : memref<8x1x4xf32, #tpu.memory_space<vmem>>, vector<1x1x4xf32>
    %264 = vector.shape_cast %263 : vector<1x1x4xf32> to vector<1x4xf32>
    %265 = arith.truncf %255 : vector<1x32xf32> to vector<1x32xbf16>
    %cst_118 = arith.constant dense<0.000000e+00> : vector<1x32xf32>
    %266 = tpu.matmul %264, %1, %cst_118 {dimension_numbers = #tpu.dot_dimension_numbers<[1], [0], [0], [1], [0, 0, 1, 1], [], []>} : vector<1x4xf32>, vector<4x32xf32>, vector<1x32xf32> -> vector<1x32xf32>
    %cst_119 = arith.constant dense<0.000000e+00> : vector<1x32xf32>
    %267 = tpu.matmul %265, %9, %cst_119 {dimension_numbers = #tpu.dot_dimension_numbers<[1], [0], [0], [1], [0, 0, 1, 1], [], []>} : vector<1x32xbf16>, vector<32x32xbf16>, vector<1x32xf32> -> vector<1x32xf32>
    %268 = arith.addf %266, %267 : vector<1x32xf32>
    %269 = arith.addf %268, %17 : vector<1x32xf32>
    %cst_120 = arith.constant dense<0.000000e+00> : vector<1x32xf32>
    %270 = tpu.matmul %264, %3, %cst_120 {dimension_numbers = #tpu.dot_dimension_numbers<[1], [0], [0], [1], [0, 0, 1, 1], [], []>} : vector<1x4xf32>, vector<4x32xf32>, vector<1x32xf32> -> vector<1x32xf32>
    %cst_121 = arith.constant dense<0.000000e+00> : vector<1x32xf32>
    %271 = tpu.matmul %265, %11, %cst_121 {dimension_numbers = #tpu.dot_dimension_numbers<[1], [0], [0], [1], [0, 0, 1, 1], [], []>} : vector<1x32xbf16>, vector<32x32xbf16>, vector<1x32xf32> -> vector<1x32xf32>
    %272 = arith.addf %270, %271 : vector<1x32xf32>
    %273 = arith.addf %272, %19 : vector<1x32xf32>
    %cst_122 = arith.constant dense<0.000000e+00> : vector<1x32xf32>
    %274 = tpu.matmul %264, %5, %cst_122 {dimension_numbers = #tpu.dot_dimension_numbers<[1], [0], [0], [1], [0, 0, 1, 1], [], []>} : vector<1x4xf32>, vector<4x32xf32>, vector<1x32xf32> -> vector<1x32xf32>
    %cst_123 = arith.constant dense<0.000000e+00> : vector<1x32xf32>
    %275 = tpu.matmul %265, %13, %cst_123 {dimension_numbers = #tpu.dot_dimension_numbers<[1], [0], [0], [1], [0, 0, 1, 1], [], []>} : vector<1x32xbf16>, vector<32x32xbf16>, vector<1x32xf32> -> vector<1x32xf32>
    %276 = arith.addf %274, %275 : vector<1x32xf32>
    %277 = arith.addf %276, %21 : vector<1x32xf32>
    %cst_124 = arith.constant dense<0.000000e+00> : vector<1x32xf32>
    %278 = tpu.matmul %264, %7, %cst_124 {dimension_numbers = #tpu.dot_dimension_numbers<[1], [0], [0], [1], [0, 0, 1, 1], [], []>} : vector<1x4xf32>, vector<4x32xf32>, vector<1x32xf32> -> vector<1x32xf32>
    %cst_125 = arith.constant dense<0.000000e+00> : vector<1x32xf32>
    %279 = tpu.matmul %265, %15, %cst_125 {dimension_numbers = #tpu.dot_dimension_numbers<[1], [0], [0], [1], [0, 0, 1, 1], [], []>} : vector<1x32xbf16>, vector<32x32xbf16>, vector<1x32xf32> -> vector<1x32xf32>
    %280 = arith.addf %278, %279 : vector<1x32xf32>
    %281 = arith.addf %280, %23 : vector<1x32xf32>
    %282 = arith.negf %269 : vector<1x32xf32>
    %283 = math.exp %282 : vector<1x32xf32>
    %cst_126 = arith.constant 1.000000e+00 : f32
    %284 = vector.broadcast %cst_126 : f32 to vector<1x32xf32>
    %285 = arith.addf %284, %283 : vector<1x32xf32>
    %286 = arith.divf %284, %285 : vector<1x32xf32>
    %287 = arith.negf %273 : vector<1x32xf32>
    %288 = math.exp %287 : vector<1x32xf32>
    %cst_127 = arith.constant 1.000000e+00 : f32
    %289 = vector.broadcast %cst_127 : f32 to vector<1x32xf32>
    %290 = arith.addf %289, %288 : vector<1x32xf32>
    %291 = arith.divf %289, %290 : vector<1x32xf32>
    %292 = math.tanh %277 : vector<1x32xf32>
    %293 = arith.negf %281 : vector<1x32xf32>
    %294 = math.exp %293 : vector<1x32xf32>
    %cst_128 = arith.constant 1.000000e+00 : f32
    %295 = vector.broadcast %cst_128 : f32 to vector<1x32xf32>
    %296 = arith.addf %295, %294 : vector<1x32xf32>
    %297 = arith.divf %295, %296 : vector<1x32xf32>
    %298 = arith.mulf %291, %253 : vector<1x32xf32>
    %299 = arith.mulf %286, %292 : vector<1x32xf32>
    %300 = arith.addf %298, %299 : vector<1x32xf32>
    %301 = math.tanh %300 : vector<1x32xf32>
    %302 = arith.mulf %297, %301 : vector<1x32xf32>
    %cst_129 = arith.constant 0.000000e+00 : f32
    %303 = vector.broadcast %cst_129 : f32 to vector<1x32xf32>
    %304 = arith.maximumf %302, %303 : vector<1x32xf32>
    %305 = arith.mulf %304, %24 : vector<1x32xf32>
    %cst_130 = arith.constant dense<0.000000e+00> : vector<1xf32>
    %306 = vector.multi_reduction <add>, %305, %cst_130 [1] : vector<1x32xf32> to vector<1xf32>
    %307 = vector.shape_cast %306 : vector<1xf32> to vector<1x1xf32>
    %308 = arith.addf %307, %25 : vector<1x1xf32>
    %309 = vector.shape_cast %308 : vector<1x1xf32> to vector<1x1x1xf32>
    %c6 = arith.constant 6 : index
    %c0_131 = arith.constant 0 : index
    %c0_132 = arith.constant 0 : index
    %310 = vector.load %arg1[%c6, %c0_131, %c0_132] : memref<8x1x4xf32, #tpu.memory_space<vmem>>, vector<1x1x4xf32>
    %311 = vector.shape_cast %310 : vector<1x1x4xf32> to vector<1x4xf32>
    %312 = arith.truncf %302 : vector<1x32xf32> to vector<1x32xbf16>
    %cst_133 = arith.constant dense<0.000000e+00> : vector<1x32xf32>
    %313 = tpu.matmul %311, %1, %cst_133 {dimension_numbers = #tpu.dot_dimension_numbers<[1], [0], [0], [1], [0, 0, 1, 1], [], []>} : vector<1x4xf32>, vector<4x32xf32>, vector<1x32xf32> -> vector<1x32xf32>
    %cst_134 = arith.constant dense<0.000000e+00> : vector<1x32xf32>
    %314 = tpu.matmul %312, %9, %cst_134 {dimension_numbers = #tpu.dot_dimension_numbers<[1], [0], [0], [1], [0, 0, 1, 1], [], []>} : vector<1x32xbf16>, vector<32x32xbf16>, vector<1x32xf32> -> vector<1x32xf32>
    %315 = arith.addf %313, %314 : vector<1x32xf32>
    %316 = arith.addf %315, %17 : vector<1x32xf32>
    %cst_135 = arith.constant dense<0.000000e+00> : vector<1x32xf32>
    %317 = tpu.matmul %311, %3, %cst_135 {dimension_numbers = #tpu.dot_dimension_numbers<[1], [0], [0], [1], [0, 0, 1, 1], [], []>} : vector<1x4xf32>, vector<4x32xf32>, vector<1x32xf32> -> vector<1x32xf32>
    %cst_136 = arith.constant dense<0.000000e+00> : vector<1x32xf32>
    %318 = tpu.matmul %312, %11, %cst_136 {dimension_numbers = #tpu.dot_dimension_numbers<[1], [0], [0], [1], [0, 0, 1, 1], [], []>} : vector<1x32xbf16>, vector<32x32xbf16>, vector<1x32xf32> -> vector<1x32xf32>
    %319 = arith.addf %317, %318 : vector<1x32xf32>
    %320 = arith.addf %319, %19 : vector<1x32xf32>
    %cst_137 = arith.constant dense<0.000000e+00> : vector<1x32xf32>
    %321 = tpu.matmul %311, %5, %cst_137 {dimension_numbers = #tpu.dot_dimension_numbers<[1], [0], [0], [1], [0, 0, 1, 1], [], []>} : vector<1x4xf32>, vector<4x32xf32>, vector<1x32xf32> -> vector<1x32xf32>
    %cst_138 = arith.constant dense<0.000000e+00> : vector<1x32xf32>
    %322 = tpu.matmul %312, %13, %cst_138 {dimension_numbers = #tpu.dot_dimension_numbers<[1], [0], [0], [1], [0, 0, 1, 1], [], []>} : vector<1x32xbf16>, vector<32x32xbf16>, vector<1x32xf32> -> vector<1x32xf32>
    %323 = arith.addf %321, %322 : vector<1x32xf32>
    %324 = arith.addf %323, %21 : vector<1x32xf32>
    %cst_139 = arith.constant dense<0.000000e+00> : vector<1x32xf32>
    %325 = tpu.matmul %311, %7, %cst_139 {dimension_numbers = #tpu.dot_dimension_numbers<[1], [0], [0], [1], [0, 0, 1, 1], [], []>} : vector<1x4xf32>, vector<4x32xf32>, vector<1x32xf32> -> vector<1x32xf32>
    %cst_140 = arith.constant dense<0.000000e+00> : vector<1x32xf32>
    %326 = tpu.matmul %312, %15, %cst_140 {dimension_numbers = #tpu.dot_dimension_numbers<[1], [0], [0], [1], [0, 0, 1, 1], [], []>} : vector<1x32xbf16>, vector<32x32xbf16>, vector<1x32xf32> -> vector<1x32xf32>
    %327 = arith.addf %325, %326 : vector<1x32xf32>
    %328 = arith.addf %327, %23 : vector<1x32xf32>
    %329 = arith.negf %316 : vector<1x32xf32>
    %330 = math.exp %329 : vector<1x32xf32>
    %cst_141 = arith.constant 1.000000e+00 : f32
    %331 = vector.broadcast %cst_141 : f32 to vector<1x32xf32>
    %332 = arith.addf %331, %330 : vector<1x32xf32>
    %333 = arith.divf %331, %332 : vector<1x32xf32>
    %334 = arith.negf %320 : vector<1x32xf32>
    %335 = math.exp %334 : vector<1x32xf32>
    %cst_142 = arith.constant 1.000000e+00 : f32
    %336 = vector.broadcast %cst_142 : f32 to vector<1x32xf32>
    %337 = arith.addf %336, %335 : vector<1x32xf32>
    %338 = arith.divf %336, %337 : vector<1x32xf32>
    %339 = math.tanh %324 : vector<1x32xf32>
    %340 = arith.negf %328 : vector<1x32xf32>
    %341 = math.exp %340 : vector<1x32xf32>
    %cst_143 = arith.constant 1.000000e+00 : f32
    %342 = vector.broadcast %cst_143 : f32 to vector<1x32xf32>
    %343 = arith.addf %342, %341 : vector<1x32xf32>
    %344 = arith.divf %342, %343 : vector<1x32xf32>
    %345 = arith.mulf %338, %300 : vector<1x32xf32>
    %346 = arith.mulf %333, %339 : vector<1x32xf32>
    %347 = arith.addf %345, %346 : vector<1x32xf32>
    %348 = math.tanh %347 : vector<1x32xf32>
    %349 = arith.mulf %344, %348 : vector<1x32xf32>
    %cst_144 = arith.constant 0.000000e+00 : f32
    %350 = vector.broadcast %cst_144 : f32 to vector<1x32xf32>
    %351 = arith.maximumf %349, %350 : vector<1x32xf32>
    %352 = arith.mulf %351, %24 : vector<1x32xf32>
    %cst_145 = arith.constant dense<0.000000e+00> : vector<1xf32>
    %353 = vector.multi_reduction <add>, %352, %cst_145 [1] : vector<1x32xf32> to vector<1xf32>
    %354 = vector.shape_cast %353 : vector<1xf32> to vector<1x1xf32>
    %355 = arith.addf %354, %25 : vector<1x1xf32>
    %356 = vector.shape_cast %355 : vector<1x1xf32> to vector<1x1x1xf32>
    %c7 = arith.constant 7 : index
    %c0_146 = arith.constant 0 : index
    %c0_147 = arith.constant 0 : index
    %357 = vector.load %arg1[%c7, %c0_146, %c0_147] : memref<8x1x4xf32, #tpu.memory_space<vmem>>, vector<1x1x4xf32>
    %358 = vector.shape_cast %357 : vector<1x1x4xf32> to vector<1x4xf32>
    %359 = arith.truncf %349 : vector<1x32xf32> to vector<1x32xbf16>
    %cst_148 = arith.constant dense<0.000000e+00> : vector<1x32xf32>
    %360 = tpu.matmul %358, %1, %cst_148 {dimension_numbers = #tpu.dot_dimension_numbers<[1], [0], [0], [1], [0, 0, 1, 1], [], []>} : vector<1x4xf32>, vector<4x32xf32>, vector<1x32xf32> -> vector<1x32xf32>
    %cst_149 = arith.constant dense<0.000000e+00> : vector<1x32xf32>
    %361 = tpu.matmul %359, %9, %cst_149 {dimension_numbers = #tpu.dot_dimension_numbers<[1], [0], [0], [1], [0, 0, 1, 1], [], []>} : vector<1x32xbf16>, vector<32x32xbf16>, vector<1x32xf32> -> vector<1x32xf32>
    %362 = arith.addf %360, %361 : vector<1x32xf32>
    %363 = arith.addf %362, %17 : vector<1x32xf32>
    %cst_150 = arith.constant dense<0.000000e+00> : vector<1x32xf32>
    %364 = tpu.matmul %358, %3, %cst_150 {dimension_numbers = #tpu.dot_dimension_numbers<[1], [0], [0], [1], [0, 0, 1, 1], [], []>} : vector<1x4xf32>, vector<4x32xf32>, vector<1x32xf32> -> vector<1x32xf32>
    %cst_151 = arith.constant dense<0.000000e+00> : vector<1x32xf32>
    %365 = tpu.matmul %359, %11, %cst_151 {dimension_numbers = #tpu.dot_dimension_numbers<[1], [0], [0], [1], [0, 0, 1, 1], [], []>} : vector<1x32xbf16>, vector<32x32xbf16>, vector<1x32xf32> -> vector<1x32xf32>
    %366 = arith.addf %364, %365 : vector<1x32xf32>
    %367 = arith.addf %366, %19 : vector<1x32xf32>
    %cst_152 = arith.constant dense<0.000000e+00> : vector<1x32xf32>
    %368 = tpu.matmul %358, %5, %cst_152 {dimension_numbers = #tpu.dot_dimension_numbers<[1], [0], [0], [1], [0, 0, 1, 1], [], []>} : vector<1x4xf32>, vector<4x32xf32>, vector<1x32xf32> -> vector<1x32xf32>
    %cst_153 = arith.constant dense<0.000000e+00> : vector<1x32xf32>
    %369 = tpu.matmul %359, %13, %cst_153 {dimension_numbers = #tpu.dot_dimension_numbers<[1], [0], [0], [1], [0, 0, 1, 1], [], []>} : vector<1x32xbf16>, vector<32x32xbf16>, vector<1x32xf32> -> vector<1x32xf32>
    %370 = arith.addf %368, %369 : vector<1x32xf32>
    %371 = arith.addf %370, %21 : vector<1x32xf32>
    %cst_154 = arith.constant dense<0.000000e+00> : vector<1x32xf32>
    %372 = tpu.matmul %358, %7, %cst_154 {dimension_numbers = #tpu.dot_dimension_numbers<[1], [0], [0], [1], [0, 0, 1, 1], [], []>} : vector<1x4xf32>, vector<4x32xf32>, vector<1x32xf32> -> vector<1x32xf32>
    %cst_155 = arith.constant dense<0.000000e+00> : vector<1x32xf32>
    %373 = tpu.matmul %359, %15, %cst_155 {dimension_numbers = #tpu.dot_dimension_numbers<[1], [0], [0], [1], [0, 0, 1, 1], [], []>} : vector<1x32xbf16>, vector<32x32xbf16>, vector<1x32xf32> -> vector<1x32xf32>
    %374 = arith.addf %372, %373 : vector<1x32xf32>
    %375 = arith.addf %374, %23 : vector<1x32xf32>
    %376 = arith.negf %363 : vector<1x32xf32>
    %377 = math.exp %376 : vector<1x32xf32>
    %cst_156 = arith.constant 1.000000e+00 : f32
    %378 = vector.broadcast %cst_156 : f32 to vector<1x32xf32>
    %379 = arith.addf %378, %377 : vector<1x32xf32>
    %380 = arith.divf %378, %379 : vector<1x32xf32>
    %381 = arith.negf %367 : vector<1x32xf32>
    %382 = math.exp %381 : vector<1x32xf32>
    %cst_157 = arith.constant 1.000000e+00 : f32
    %383 = vector.broadcast %cst_157 : f32 to vector<1x32xf32>
    %384 = arith.addf %383, %382 : vector<1x32xf32>
    %385 = arith.divf %383, %384 : vector<1x32xf32>
    %386 = math.tanh %371 : vector<1x32xf32>
    %387 = arith.negf %375 : vector<1x32xf32>
    %388 = math.exp %387 : vector<1x32xf32>
    %cst_158 = arith.constant 1.000000e+00 : f32
    %389 = vector.broadcast %cst_158 : f32 to vector<1x32xf32>
    %390 = arith.addf %389, %388 : vector<1x32xf32>
    %391 = arith.divf %389, %390 : vector<1x32xf32>
    %392 = arith.mulf %385, %347 : vector<1x32xf32>
    %393 = arith.mulf %380, %386 : vector<1x32xf32>
    %394 = arith.addf %392, %393 : vector<1x32xf32>
    %395 = math.tanh %394 : vector<1x32xf32>
    %396 = arith.mulf %391, %395 : vector<1x32xf32>
    %cst_159 = arith.constant 0.000000e+00 : f32
    %397 = vector.broadcast %cst_159 : f32 to vector<1x32xf32>
    %398 = arith.maximumf %396, %397 : vector<1x32xf32>
    %399 = arith.mulf %398, %24 : vector<1x32xf32>
    %cst_160 = arith.constant dense<0.000000e+00> : vector<1xf32>
    %400 = vector.multi_reduction <add>, %399, %cst_160 [1] : vector<1x32xf32> to vector<1xf32>
    %401 = vector.shape_cast %400 : vector<1xf32> to vector<1x1xf32>
    %402 = arith.addf %401, %25 : vector<1x1xf32>
    %403 = vector.shape_cast %402 : vector<1x1xf32> to vector<1x1x1xf32>
    %404 = tpu.concatenate %74, %121, %168, %215, %262, %309, %356, %403 in 0 : vector<1x1x1xf32>, vector<1x1x1xf32>, vector<1x1x1xf32>, vector<1x1x1xf32>, vector<1x1x1xf32>, vector<1x1x1xf32>, vector<1x1x1xf32>, vector<1x1x1xf32> -> vector<8x1x1xf32>
    %c0_161 = arith.constant 0 : index
    %c0_162 = arith.constant 0 : index
    %c0_163 = arith.constant 0 : index
    %405 = vector.load %arg7[%c0_161, %c0_162, %c0_163] : memref<8x1x1xf32, #tpu.memory_space<vmem>>, vector<8x1x1xf32>
    tpu.vector_store %arg7[%c0_161, %c0_162, %c0_163], %404 {strides = array<i32>} : memref<8x1x1xf32, #tpu.memory_space<vmem>>, vector<8x1x1xf32>,
    return
  }
  func.func @transform_0(%arg0: i32) -> (i32, i32, i32) {
    %c0_i32 = arith.constant 0 : i32
    %c0_i32_0 = arith.constant 0 : i32
    %c0_i32_1 = arith.constant 0 : i32
    return %c0_i32, %arg0, %c0_i32_0 : i32, i32, i32
  }
  func.func @transform_1(%arg0: i32) -> (i32, i32, i32) {
    %c0_i32 = arith.constant 0 : i32
    %c0_i32_0 = arith.constant 0 : i32
    %c0_i32_1 = arith.constant 0 : i32
    %c0_i32_2 = arith.constant 0 : i32
    return %c0_i32, %c0_i32_0, %c0_i32_1 : i32, i32, i32
  }
  func.func @transform_2(%arg0: i32) -> (i32, i32, i32) {
    %c0_i32 = arith.constant 0 : i32
    %c0_i32_0 = arith.constant 0 : i32
    %c0_i32_1 = arith.constant 0 : i32
    %c0_i32_2 = arith.constant 0 : i32
    return %c0_i32, %c0_i32_0, %c0_i32_1 : i32, i32, i32
  }
  func.func @transform_3(%arg0: i32) -> (i32, i32, i32) {
    %c0_i32 = arith.constant 0 : i32
    %c0_i32_0 = arith.constant 0 : i32
    %c0_i32_1 = arith.constant 0 : i32
    %c0_i32_2 = arith.constant 0 : i32
    return %c0_i32, %c0_i32_0, %c0_i32_1 : i32, i32, i32
  }
  func.func @transform_4(%arg0: i32) -> (i32, i32) {
    %c0_i32 = arith.constant 0 : i32
    %c0_i32_0 = arith.constant 0 : i32
    %c0_i32_1 = arith.constant 0 : i32
    return %c0_i32, %c0_i32_0 : i32, i32
  }
  func.func @transform_5(%arg0: i32) -> (i32, i32) {
    %c0_i32 = arith.constant 0 : i32
    %c0_i32_0 = arith.constant 0 : i32
    %c0_i32_1 = arith.constant 0 : i32
    return %c0_i32, %c0_i32_0 : i32, i32
  }
  func.func @transform_6(%arg0: i32) -> (i32, i32, i32) {
    %c0_i32 = arith.constant 0 : i32
    %c0_i32_0 = arith.constant 0 : i32
    %c0_i32_1 = arith.constant 0 : i32
    return %c0_i32, %arg0, %c0_i32_0 : i32, i32, i32
  }
}

</mosaic_0001>

<bundles_post_ra>
// kernel: dense_lstm_forward_batched.1
= control target key start
LH: loop header
LB: loop body
LE: loop exit
PB: predicated region body
PF: predicated region fallthrough
CT: control target
= control target key end

     0   :  { %v4882_v0 = vmov 0.0   ;;  %vm4883_vm0 = vmmov 0   ;;  %vm122_vm1 = vcmask 1043456   ;;  %v4884_v6 = vmov 0   ;;  %s5691_s2 = inlined_call_operand.vmem [shape: bf16[4,32,32], index: 2, kind: input, shape index: {}]   ;;  %s5692_s1 = inlined_call_operand.vmem [shape: f32[4,4,32], index: 1, kind: input, shape index: {}]   ;;  %s5693_s0 = inlined_call_operand.vmem [shape: f32[8,1,4], index: 0, kind: input, shape index: {}]   ;;  %s5694_s5 = inlined_call_operand.<no memory space> [shape: f32[1,1], index: 5, kind: input, shape index: {}]   ;;  %s5695_s3 = inlined_call_operand.vmem [shape: f32[4,1,32], index: 3, kind: input, shape index: {}]   ;;  %s5696_s4 = inlined_call_operand.vmem [shape: f32[1,32], index: 4, kind: input, shape index: {}]   ;;  %s5697_s6 = inlined_call_operand.vmem [shape: f32[8,1,1], index: 6, kind: output, shape index: {}]  }
   0x1   :  { %4309 = vmatprep.subr.bf16.mxu0 %v4882_v0  ;;  %v4924_v1 = vld [vmem:[%s5691_s2] sm:$0xff]   ;;  %4313 = vmatprep.mubr.msk.bf16.mxu0 %vm4883_vm0, %v4882_v0  ;;  %v4935_v2 = vld [vmem:[%s5691_s2 + $0x8] sm:$0xff]   ;;  %v4941_v3 = vld [vmem:[%s5691_s2 + $0x10] sm:$0xff]   ;;  %vm118_vm2 = vcmask 31744   ;;  %v11_v16 = vstv %s5694_s5  ;;  %vm74_vm3 = vcmask 261120   ;;  %vm601_vm4 = vcmask 253952  }
   0x2   :  { %4322 = vmatprep.subr.bf16.mxu1 %v4882_v0  ;;  %4326 = vmatprep.mubr.msk.bf16.mxu1 %vm4883_vm0, %v4882_v0  ;;  %v4947_v4 = vld [vmem:[%s5691_s2 + $0x18] sm:$0xff]   ;;  %v4955_v5 = vld [vmem:[%s5692_s1] sm:$0xf]  ;;  %v4973_v8 = vld [vmem:[%s5691_s2 + $0x28] sm:$0xff]   ;;  %12 = vst [vmem:[#allocation2] sm:$0x1] %v11_v16 }
   0x3   :  { %4310 = vmatpush3.bf16.msra.mxu0 %v4924_v1  ;;  %4323 = vmatpush3.bf16.msra.mxu1 %v4941_v3  ;;  %v4961_v7 = vld [vmem:[%s5691_s2 + $0x20] sm:$0xff]   ;;  %v4991_v11 = vld [vmem:[%s5691_s2 + $0x30] sm:$0xff]   ;;  %v5002_v12 = vld [vmem:[%s5692_s1 + $0x8] sm:$0xf]  ;;  %vm3987_vm5 = vcmask 0  }
   0x4   :  { %4311 = vmatprep.subr.bf16.mxu0 %v4882_v0  ;;  %4324 = vmatprep.subr.bf16.mxu1 %v4882_v0  ;;  %v61_v9 = vld [vmem:[%s5693_s0] sm:$0x1]  ;;  %v4984_v10 = vld [vmem:[%s5692_s1 + $0x4] sm:$0xf]  ;;  %v5009_v13 = vld [vmem:[%s5691_s2 + $0x38] sm:$0xff]  }
   0x5   :  { %v5020_v14 = vld [vmem:[%s5692_s1 + $0xc] sm:$0xf]  ;;  %v5047_v15 = vld [vmem:[%s5693_s0 + $0x1] sm:$0x1]  ;;  %v5070_v25 = vld [vmem:[%s5695_s3] sm:$0x1] }
   0x6   :  { %v5076_v31 = vld [vmem:[%s5695_s3 + $0x1] sm:$0x1]  ;;  %v5082_v44 = vld [vmem:[%s5695_s3 + $0x2] sm:$0x1]  ;;  %v5087_v47 = vld [vmem:[%s5695_s3 + $0x3] sm:$0x1] }
   0x7   :  { %4312 = vmatpush3.bf16.msra.mxu0 %v4935_v2  ;;  %4325 = vmatpush3.bf16.msra.mxu1 %v4947_v4 }
   0x8   :  { %4317 = vmatprep.subr.mxu0 %v4882_v0  ;;  %4335 = vmatprep.subr.bf16.mxu1 %v4882_v0 }
   0xa   :  { %4314 = vmatmul.mubr.bf16.vlgmr.msra.gmra.mrb[0].mxu0 %v4884_v6  ;;  %4327 = vmatmul.mubr.bf16.vlgmr.msra.gmra.mrb[0].mxu1 %v4884_v6 }
   0xb   :  { %4318 = vmatpush3.msk.msra.mxu0 %vm122_vm1, %v4955_v5  ;;  %4319 = vmatprep.mubr.msk.f32.mxu0 %vm4883_vm0, %v4882_v0 }
   0xc   :  { %4330 = vmatprep.subr.mxu0 %v4882_v0  ;;  %4336 = vmatpush3.bf16.msra.mxu1 %v4961_v7 }
   0xd   :  { %4339 = vmatprep.mubr.msk.bf16.mxu1 %vm4883_vm0, %v4882_v0  ;;  %4337 = vmatprep.subr.bf16.mxu1 %v4882_v0 }
  0x10   :  { %4338 = vmatpush3.bf16.msra.mxu1 %v4973_v8 }
  0x11   :  { %4348 = vmatprep.subr.bf16.mxu1 %v4882_v0 }
  0x12   :  { %4320 = vmatmul.mubr.msk.f32.vlgmr.msra.gmra.mrb[4].mxu0 %vm118_vm2, %v61_v9 }
  0x13   :  { %4331 = vmatpush3.msk.msra.mxu0 %vm122_vm1, %v4984_v10  ;;  %4332 = vmatprep.mubr.msk.f32.mxu0 %vm4883_vm0, %v4882_v0 }
  0x14   :  { %4343 = vmatprep.subr.mxu0 %v4882_v0  ;;  %4340 = vmatmul.mubr.bf16.vlgmr.msra.gmra.mrb[4].mxu1 %v4884_v6 }
  0x15   :  { %4349 = vmatpush3.bf16.msra.mxu1 %v4991_v11  ;;  %4352 = vmatprep.mubr.msk.bf16.mxu1 %vm4883_vm0, %v4882_v0 }
  0x16   :  { %4333 = vmatmul.mubr.msk.f32.vlgmr.msra.gmra.mrb[6].mxu0 %vm118_vm2, %v61_v9  ;;  %4350 = vmatprep.subr.bf16.mxu1 %v4882_v0 }
  0x17   :  { %4344 = vmatpush3.msk.msra.mxu0 %vm122_vm1, %v5002_v12  ;;  %4345 = vmatprep.mubr.msk.f32.mxu0 %vm4883_vm0, %v4882_v0 }
  0x18   :  { %4356 = vmatprep.subr.mxu0 %v4882_v0 }
  0x19   :  { %4351 = vmatpush3.bf16.msra.mxu1 %v5009_v13 }
  0x1a   :  { %4346 = vmatmul.mubr.msk.f32.vlgmr.msra.gmra.mrb[8].mxu0 %vm118_vm2, %v61_v9  ;;  %4369 = vmatprep.subr.mxu1 %v4882_v0 }
  0x1b   :  { %4357 = vmatpush3.msk.msra.mxu0 %vm122_vm1, %v5020_v14  ;;  %4358 = vmatprep.mubr.msk.f32.mxu0 %vm4883_vm0, %v4882_v0 }
  0x1c   :  { %4361 = vmatprep.subr.bf16.mxu0 %v4882_v0  ;;  %4353 = vmatmul.mubr.bf16.vlgmr.msra.gmra.mrb[8].mxu1 %v4884_v6 }
  0x1d   :  { %4370 = vmatpush3.msk.msra.mxu1 %vm122_vm1, %v4955_v5  ;;  %4371 = vmatprep.mubr.msk.f32.mxu1 %vm4883_vm0, %v4882_v0 }
  0x1e   :  { %4359 = vmatmul.mubr.msk.f32.vlgmr.msra.gmra.mrb[10].mxu0 %vm118_vm2, %v61_v9  ;;  %4382 = vmatprep.subr.mxu1 %v4882_v0 }
  0x1f   :  { %4362 = vmatpush3.bf16.msra.mxu0 %v4924_v1  ;;  %4365 = vmatprep.mubr.msk.bf16.mxu0 %vm4883_vm0, %v4882_v0 }
  0x20   :  { %4363 = vmatprep.subr.bf16.mxu0 %v4882_v0 }
  0x23   :  { %4364 = vmatpush3.bf16.msra.mxu0 %v4935_v2 }
  0x24   :  { %4374 = vmatprep.subr.bf16.mxu0 %v4882_v0  ;;  %4372 = vmatmul.mubr.msk.f32.vlgmr.msra.gmra.mrb[12].mxu1 %vm118_vm2, %v5047_v15 }
  0x25   :  { %4383 = vmatpush3.msk.msra.mxu1 %vm122_vm1, %v4984_v10  ;;  %4384 = vmatprep.mubr.msk.f32.mxu1 %vm4883_vm0, %v4882_v0 }
  0x26   :  { %4387 = vmatprep.subr.bf16.mxu1 %v4882_v0 }
  0x28   :  { %4385 = vmatmul.mubr.msk.f32.vlgmr.msra.gmra.mrb[14].mxu1 %vm118_vm2, %v5047_v15 }
  0x29   :  { %4388 = vmatpush3.bf16.msra.mxu1 %v4961_v7  ;;  %4391 = vmatprep.mubr.msk.bf16.mxu1 %vm4883_vm0, %v4882_v0 }
  0x2a   :  { %4389 = vmatprep.subr.bf16.mxu1 %v4882_v0 }
  0x2d   :  { %4390 = vmatpush3.bf16.msra.mxu1 %v4973_v8 }
  0x2e   :  { %4400 = vmatprep.subr.bf16.mxu1 %v4882_v0 }
  0xdd   :  { %v112_v17 = vpop.f32.mrb[0].mxu0  ;;  %v243_v21 = vpop.f32.mrb[0].mxu1 }
  0xde   :  { %v4315_v18 = vpop.f32.mrb[1].mxu0  ;;  %v4328_v22 = vpop.f32.mrb[1].mxu1 }
  0xdf   :  { %v115_v19 = vpop.f32.mrb[2].mxu0  ;;  %v246_v23 = vpop.f32.mrb[2].mxu1 }
  0xe0   :  { %v4316_v20 = vpop.f32.mrb[3].mxu0  ;;  %v4329_v24 = vpop.f32.mrb[3].mxu1 }
  0xe5   :  { %v192_v26 = vpop.f32.mrb[4].mxu0 }
  0xe6   :  { %v193_v27 = vadd.f32 %v192_v26, %v112_v17  ;;  %v4321_v28 = vpop.f32.mrb[5].mxu0 }
  0xe7   :  { %v369_v30 = vpop.f32.mrb[4].mxu1 }
  0xe8   :  { %v196_v29 = vadd.f32 %v193_v27, %v5070_v25  ;;  %v4341_v33 = vpop.f32.mrb[5].mxu1 }
  0xe9   :  { %v318_v32 = vpop.f32.mrb[6].mxu0  ;;  %v372_v37 = vpop.f32.mrb[6].mxu1 }
  0xea   :  { %v4034_v34 = vmul.f32 -1.442695, %v196_v29  ;;  %v319_v35 = vadd.f32 %v318_v32, %v243_v21  ;;  %v4334_v36 = vpop.f32.mrb[7].mxu0  ;;  %v4342_v38 = vpop.f32.mrb[7].mxu1  ;;  %v5097_v21 = vld [vmem:[%s5696_s4] sm:$0x1] }
  0xeb   :  { %v5145_v32 = vld [vmem:[%s5693_s0 + $0x2] sm:$0x1] }
  0xec   :  { %4736 = vpow2.f32 %v4034_v34  ;;  %v322_v39 = vadd.f32 %v5076_v31, %v319_v35 }
  0xed   :  { %v444_v40 = vpop.f32.mrb[8].mxu0 }
  0xee   :  { %v4035_v41 = vmul.f32 -1.442695, %v322_v39  ;;  %v445_v42 = vadd.f32 %v444_v40, %v369_v30  ;;  %v4347_v43 = vpop.f32.mrb[9].mxu0 }
  0xef   :  { %v495_v45 = vpop.f32.mrb[8].mxu1 }
  0xf0   :  { %4738 = vpow2.f32 %v4035_v41  ;;  %v4354_v46 = vpop.f32.mrb[9].mxu1  ;;  %v448_v52 = vadd.f32 %v5082_v44, %v445_v42 }
  0xf1   :  { %v570_v48 = vpop.f32.mrb[10].mxu0  ;;  %v498_v49 = vpop.f32.mrb[10].mxu1 }
  0xf2   :  { %v571_v50 = vadd.f32 %v570_v48, %v495_v45  ;;  %v4360_v51 = vpop.f32.mrb[11].mxu0  ;;  %v4355_v53 = vpop.f32.mrb[11].mxu1  ;;  %4740 = vtanh.f32 %v448_v52 }
  0xf4   :  { %v574_v54 = vadd.f32 %v5087_v47, %v571_v50 }
  0xf6   :  { %v4737_v55 = vpop.eup %4736  ;;  %v4036_v56 = vmul.f32 -1.442695, %v574_v54 }
  0xf7   :  { %v578_v57 = vadd.f32 1.0, %v4737_v55  ;;  %v721_v27 = vpop.f32.mrb[12].mxu1 }
  0xf8   :  { %4742 = vpow2.f32 %v4036_v56  ;;  %v4373_v28 = vpop.f32.mrb[13].mxu1 }
  0xf9   :  { %4744 = vrcp.f32 %v578_v57 }
  0xfa   :  { %v4739_v58 = vpop.eup %4738 }
  0xfb   :  { %v584_v59 = vadd.f32 1.0, %v4739_v58  ;;  %v832_v29 = vpop.f32.mrb[14].mxu1 }
  0xfc   :  { %v4741_v60 = vpop.eup %4740  ;;  %v4386_v30 = vpop.f32.mrb[15].mxu1 }
  0xfd   :  { %4746 = vrcp.f32 %v584_v59 }
 0x102   :  { %v4743_v61 = vpop.eup %4742 }
 0x103   :  { %v4745_v62 = vpop.eup %4744  ;;  %v591_v6 = vadd.f32 1.0, %v4743_v61 }
 0x104   :  { %v595_v63 = vmul.f32 %v4745_v62, %v4741_v60 }
 0x105   :  { %4748 = vrcp.f32 %v591_v6 }
 0x107   :  { %v4747_v9 = vpop.eup %4746 }
 0x108   :  { %v594_v16 = vmul.f32 0.0, %v4747_v9 }
 0x10a   :  { %v5091_v17 = vadd.f32 %v595_v63, %v594_v16 }
 0x10c   :  { %4750 = vtanh.f32 %v5091_v17 }
 0x10f   :  { %v4749_v18 = vpop.eup %4748 }
 0x116   :  { %v4751_v19 = vpop.eup %4750 }
 0x117   :  { %v598_v20 = vmul.f32 %v4751_v19, %v4749_v18 }
 0x119   :  { %v608_v22 = vpack.c.bf16 %v598_v20, %v598_v20  ;;  %v599_v23 = vmax.f32 %v598_v20, 0.0 }
 0x11b   :  { %4366 = vmatmul.mubr.msk.bf16.vlgmr.msra.gmra.mrb[12].mxu0 %vm74_vm3, %v608_v22  ;;  %4392 = vmatmul.mubr.msk.bf16.vlgmr.msra.gmra.mrb[16].mxu1 %vm74_vm3, %v608_v22  ;;  %v600_v24 = vmul.f32 %v599_v23, %v5097_v21 }
 0x11c   :  { %4375 = vmatpush3.bf16.msra.mxu0 %v4941_v3  ;;  %4401 = vmatpush3.bf16.msra.mxu1 %v4991_v11 }
 0x11d   :  { %v602_v26 = vsel %vm601_vm4, %v600_v24, 0.0  ;;  %4376 = vmatprep.subr.bf16.mxu0 %v4882_v0  ;;  %4402 = vmatprep.subr.bf16.mxu1 %v4882_v0 }
 0x11e   :  { %603 = vadd.xlane.f32.xlu0 %v602_v26  ;;  %4378 = vmatprep.mubr.msk.bf16.mxu0 %vm4883_vm0, %v4882_v0 }
 0x11f   :  { %4404 = vmatprep.mubr.msk.bf16.mxu1 %vm4883_vm0, %v4882_v0 }
 0x120   :  { %4377 = vmatpush3.bf16.msra.mxu0 %v4947_v4  ;;  %4403 = vmatpush3.bf16.msra.mxu1 %v5009_v13 }
 0x121   :  { %4395 = vmatprep.subr.mxu0 %v4882_v0  ;;  %4421 = vmatprep.subr.mxu1 %v4882_v0 }
 0x123   :  { %4379 = vmatmul.mubr.msk.bf16.vlgmr.msra.gmra.mrb[16].mxu0 %vm74_vm3, %v608_v22  ;;  %4405 = vmatmul.mubr.msk.bf16.vlgmr.msra.gmra.mrb[20].mxu1 %vm74_vm3, %v608_v22 }
 0x124   :  { %4396 = vmatpush3.msk.msra.mxu0 %vm122_vm1, %v5002_v12  ;;  %4397 = vmatprep.mubr.msk.f32.mxu0 %vm4883_vm0, %v4882_v0 }
 0x125   :  { %4408 = vmatprep.subr.mxu0 %v4882_v0  ;;  %4422 = vmatpush3.msk.msra.mxu1 %vm122_vm1, %v4955_v5 }
 0x126   :  { %4423 = vmatprep.mubr.msk.f32.mxu1 %vm4883_vm0, %v4882_v0  ;;  %4434 = vmatprep.subr.mxu1 %v4882_v0 }
 0x12b   :  { %4398 = vmatmul.mubr.msk.f32.vlgmr.msra.gmra.mrb[20].mxu0 %vm118_vm2, %v5047_v15  ;;  %4424 = vmatmul.mubr.msk.f32.vlgmr.msra.gmra.mrb[24].mxu1 %vm118_vm2, %v5145_v32 }
 0x12c   :  { %4409 = vmatpush3.msk.msra.mxu0 %vm122_vm1, %v5020_v14  ;;  %4410 = vmatprep.mubr.msk.f32.mxu0 %vm4883_vm0, %v4882_v0 }
 0x12d   :  { %4413 = vmatprep.subr.bf16.mxu0 %v4882_v0  ;;  %4435 = vmatpush3.msk.msra.mxu1 %vm122_vm1, %v4984_v10 }
 0x12e   :  { %4436 = vmatprep.mubr.msk.f32.mxu1 %vm4883_vm0, %v4882_v0  ;;  %4439 = vmatprep.subr.bf16.mxu1 %v4882_v0 }
 0x12f   :  { %4411 = vmatmul.mubr.msk.f32.vlgmr.msra.gmra.mrb[22].mxu0 %vm118_vm2, %v5047_v15  ;;  %4437 = vmatmul.mubr.msk.f32.vlgmr.msra.gmra.mrb[26].mxu1 %vm118_vm2, %v5145_v32  ;;  %v5162_v15 = vld [vmem:[#allocation2] sm:$0x1] }
 0x130   :  { %4414 = vmatpush3.bf16.msra.mxu0 %v4924_v1  ;;  %4417 = vmatprep.mubr.msk.bf16.mxu0 %vm4883_vm0, %v4882_v0 }
 0x131   :  { %4415 = vmatprep.subr.bf16.mxu0 %v4882_v0  ;;  %4440 = vmatpush3.bf16.msra.mxu1 %v4961_v7 }
 0x132   :  { %4443 = vmatprep.mubr.msk.bf16.mxu1 %vm4883_vm0, %v4882_v0  ;;  %4441 = vmatprep.subr.bf16.mxu1 %v4882_v0 }
 0x134   :  { %4416 = vmatpush3.bf16.msra.mxu0 %v4935_v2 }
 0x135   :  { %4426 = vmatprep.subr.bf16.mxu0 %v4882_v0  ;;  %4442 = vmatpush3.bf16.msra.mxu1 %v4973_v8 }
 0x136   :  { %4452 = vmatprep.subr.bf16.mxu1 %v4882_v0 }
 0x1ab   :  { %v604_v33 = vpop.xlane.xlu0 %603 }
 0x1ac   :  { %v605_v34 = vadd.f32 %v604_v33, %v5162_v15 }
 0x1ae   :  { %3988 = vst.msk [vmem:[%s5697_s6] sm:$0x1] %vm3987_vm5, %v605_v34 }
 0x1ee   :  { %v646_v35 = vpop.f32.mrb[12].mxu0  ;;  %v871_v36 = vpop.f32.mrb[16].mxu1 }
 0x1ef   :  { %v722_v37 = vadd.f32 %v721_v27, %v646_v35  ;;  %v4367_v38 = vpop.f32.mrb[13].mxu0  ;;  %v4393_v39 = vpop.f32.mrb[17].mxu1 }
 0x1f0   :  { %v649_v40 = vpop.f32.mrb[14].mxu0  ;;  %v874_v41 = vpop.f32.mrb[18].mxu1 }
 0x1f1   :  { %v725_v42 = vadd.f32 %v722_v37, %v5070_v25  ;;  %v4368_v43 = vpop.f32.mrb[15].mxu0  ;;  %v4394_v45 = vpop.f32.mrb[19].mxu1 }
 0x1f3   :  { %v4050_v46 = vmul.f32 -1.442695, %v725_v42 }
 0x1f5   :  { %4752 = vpow2.f32 %v4050_v46  ;;  %v5223_v46 = vld [vmem:[%s5693_s0 + $0x3] sm:$0x1] }
 0x1f6   :  { %v760_v48 = vpop.f32.mrb[16].mxu0  ;;  %v982_v49 = vpop.f32.mrb[20].mxu1 }
 0x1f7   :  { %v833_v50 = vadd.f32 %v832_v29, %v760_v48  ;;  %v4380_v51 = vpop.f32.mrb[17].mxu0  ;;  %v4406_v52 = vpop.f32.mrb[21].mxu1 }
 0x1f8   :  { %v763_v53 = vpop.f32.mrb[18].mxu0  ;;  %v985_v54 = vpop.f32.mrb[22].mxu1 }
 0x1f9   :  { %v836_v55 = vadd.f32 %v5076_v31, %v833_v50  ;;  %v4381_v56 = vpop.f32.mrb[19].mxu0  ;;  %v4407_v57 = vpop.f32.mrb[23].mxu1 }
 0x1fb   :  { %v4051_v58 = vmul.f32 -1.442695, %v836_v55 }
 0x1fd   :  { %4754 = vpow2.f32 %v4051_v58 }
 0x1fe   :  { %v943_v59 = vpop.f32.mrb[20].mxu0  ;;  %v1204_v41 = vpop.f32.mrb[24].mxu1 }
 0x1ff   :  { %v4753_v60 = vpop.eup %4752  ;;  %v944_v61 = vadd.f32 %v943_v59, %v871_v36  ;;  %v4399_v62 = vpop.f32.mrb[21].mxu0 }
 0x200   :  { %v1062_v63 = vadd.f32 1.0, %v4753_v60  ;;  %v4425_v42 = vpop.f32.mrb[25].mxu1 }
 0x201   :  { %v947_v6 = vadd.f32 %v5082_v44, %v944_v61 }
 0x202   :  { %4756 = vrcp.f32 %v1062_v63  ;;  %v1054_v9 = vpop.f32.mrb[22].mxu0  ;;  %v1315_v43 = vpop.f32.mrb[26].mxu1 }
 0x203   :  { %4758 = vtanh.f32 %v947_v6  ;;  %v1055_v16 = vadd.f32 %v1054_v9, %v982_v49  ;;  %v4412_v18 = vpop.f32.mrb[23].mxu0  ;;  %v4438_v45 = vpop.f32.mrb[27].mxu1 }
 0x205   :  { %v1058_v19 = vadd.f32 %v5087_v47, %v1055_v16 }
 0x207   :  { %v4755_v20 = vpop.eup %4754  ;;  %v4052_v22 = vmul.f32 -1.442695, %v1058_v19 }
 0x208   :  { %v1068_v23 = vadd.f32 1.0, %v4755_v20 }
 0x209   :  { %4760 = vpow2.f32 %v4052_v22 }
 0x20a   :  { %4762 = vrcp.f32 %v1068_v23 }
 0x20c   :  { %v4757_v24 = vpop.eup %4756 }
 0x20d   :  { %v4759_v26 = vpop.eup %4758 }
 0x20e   :  { %v1079_v27 = vmul.f32 %v4759_v26, %v4757_v24 }
 0x213   :  { %v4761_v28 = vpop.eup %4760 }
 0x214   :  { %v4763_v29 = vpop.eup %4762  ;;  %v1075_v30 = vadd.f32 1.0, %v4761_v28 }
 0x215   :  { %v1078_v33 = vmul.f32 %v4763_v29, %v5091_v17 }
 0x216   :  { %4764 = vrcp.f32 %v1075_v30 }
 0x217   :  { %v5174_v34 = vadd.f32 %v1079_v27, %v1078_v33 }
 0x219   :  { %4766 = vtanh.f32 %v5174_v34 }
 0x220   :  { %v4765_v35 = vpop.eup %4764 }
 0x223   :  { %v4767_v36 = vpop.eup %4766 }
 0x224   :  { %v1082_v37 = vmul.f32 %v4767_v36, %v4765_v35 }
 0x226   :  { %v1091_v38 = vpack.c.bf16 %v1082_v37, %v1082_v37  ;;  %v1083_v39 = vmax.f32 %v1082_v37, 0.0 }
 0x228   :  { %4418 = vmatmul.mubr.msk.bf16.vlgmr.msra.gmra.mrb[24].mxu0 %vm74_vm3, %v1091_v38  ;;  %4444 = vmatmul.mubr.msk.bf16.vlgmr.msra.gmra.mrb[28].mxu1 %vm74_vm3, %v1091_v38  ;;  %v1084_v40 = vmul.f32 %v1083_v39, %v5097_v21 }
 0x229   :  { %4427 = vmatpush3.bf16.msra.mxu0 %v4941_v3  ;;  %4453 = vmatpush3.bf16.msra.mxu1 %v4991_v11 }
 0x22a   :  { %v1085_v17 = vsel %vm601_vm4, %v1084_v40, 0.0  ;;  %4428 = vmatprep.subr.bf16.mxu0 %v4882_v0  ;;  %4454 = vmatprep.subr.bf16.mxu1 %v4882_v0 }
 0x22b   :  { %1086 = vadd.xlane.f32.xlu0 %v1085_v17  ;;  %4430 = vmatprep.mubr.msk.bf16.mxu0 %vm4883_vm0, %v4882_v0 }
 0x22c   :  { %4456 = vmatprep.mubr.msk.bf16.mxu1 %vm4883_vm0, %v4882_v0 }
 0x22d   :  { %4429 = vmatpush3.bf16.msra.mxu0 %v4947_v4  ;;  %4455 = vmatpush3.bf16.msra.mxu1 %v5009_v13 }
 0x22e   :  { %4447 = vmatprep.subr.mxu0 %v4882_v0  ;;  %4473 = vmatprep.subr.mxu1 %v4882_v0 }
 0x230   :  { %4431 = vmatmul.mubr.msk.bf16.vlgmr.msra.gmra.mrb[28].mxu0 %vm74_vm3, %v1091_v38  ;;  %4457 = vmatmul.mubr.msk.bf16.vlgmr.msra.gmra.mrb[32].mxu1 %vm74_vm3, %v1091_v38 }
 0x231   :  { %4448 = vmatpush3.msk.msra.mxu0 %vm122_vm1, %v5002_v12  ;;  %4449 = vmatprep.mubr.msk.f32.mxu0 %vm4883_vm0, %v4882_v0 }
 0x232   :  { %4460 = vmatprep.subr.mxu0 %v4882_v0  ;;  %4474 = vmatpush3.msk.msra.mxu1 %vm122_vm1, %v4955_v5 }
 0x233   :  { %4475 = vmatprep.mubr.msk.f32.mxu1 %vm4883_vm0, %v4882_v0  ;;  %4486 = vmatprep.subr.mxu1 %v4882_v0 }
 0x238   :  { %4450 = vmatmul.mubr.msk.f32.vlgmr.msra.gmra.mrb[32].mxu0 %vm118_vm2, %v5145_v32  ;;  %4476 = vmatmul.mubr.msk.f32.vlgmr.msra.gmra.mrb[36].mxu1 %vm118_vm2, %v5223_v46 }
 0x239   :  { %4461 = vmatpush3.msk.msra.mxu0 %vm122_vm1, %v5020_v14  ;;  %4462 = vmatprep.mubr.msk.f32.mxu0 %vm4883_vm0, %v4882_v0 }
 0x23a   :  { %4465 = vmatprep.subr.bf16.mxu0 %v4882_v0  ;;  %4487 = vmatpush3.msk.msra.mxu1 %vm122_vm1, %v4984_v10 }
 0x23b   :  { %4488 = vmatprep.mubr.msk.f32.mxu1 %vm4883_vm0, %v4882_v0  ;;  %4491 = vmatprep.subr.bf16.mxu1 %v4882_v0 }
 0x23c   :  { %4463 = vmatmul.mubr.msk.f32.vlgmr.msra.gmra.mrb[34].mxu0 %vm118_vm2, %v5145_v32  ;;  %4489 = vmatmul.mubr.msk.f32.vlgmr.msra.gmra.mrb[38].mxu1 %vm118_vm2, %v5223_v46 }
 0x23d   :  { %4466 = vmatpush3.bf16.msra.mxu0 %v4924_v1  ;;  %4469 = vmatprep.mubr.msk.bf16.mxu0 %vm4883_vm0, %v4882_v0 }
 0x23e   :  { %4467 = vmatprep.subr.bf16.mxu0 %v4882_v0  ;;  %4492 = vmatpush3.bf16.msra.mxu1 %v4961_v7 }
 0x23f   :  { %4495 = vmatprep.mubr.msk.bf16.mxu1 %vm4883_vm0, %v4882_v0  ;;  %4493 = vmatprep.subr.bf16.mxu1 %v4882_v0 }
 0x241   :  { %4468 = vmatpush3.bf16.msra.mxu0 %v4935_v2 }
 0x242   :  { %4478 = vmatprep.subr.bf16.mxu0 %v4882_v0  ;;  %4494 = vmatpush3.bf16.msra.mxu1 %v4973_v8 }
 0x243   :  { %4504 = vmatprep.subr.bf16.mxu1 %v4882_v0 }
 0x2b8   :  { %v1087_v32 = vpop.xlane.xlu0 %1086 }
 0x2b9   :  { %v1088_v48 = vadd.f32 %v1087_v32, %v5162_v15 }
 0x2bb   :  { %3989 = vst.msk [vmem:[%s5697_s6 + $0x1] sm:$0x1] %vm3987_vm5, %v1088_v48 }
 0x2fb   :  { %v1129_v49 = vpop.f32.mrb[24].mxu0  ;;  %v1354_v50 = vpop.f32.mrb[28].mxu1 }
 0x2fc   :  { %v1205_v51 = vadd.f32 %v1204_v41, %v1129_v49  ;;  %v4419_v52 = vpop.f32.mrb[25].mxu0  ;;  %v4445_v53 = vpop.f32.mrb[29].mxu1 }
 0x2fd   :  { %v1132_v54 = vpop.f32.mrb[26].mxu0  ;;  %v1357_v55 = vpop.f32.mrb[30].mxu1 }
 0x2fe   :  { %v1208_v56 = vadd.f32 %v1205_v51, %v5070_v25  ;;  %v4420_v57 = vpop.f32.mrb[27].mxu0  ;;  %v4446_v58 = vpop.f32.mrb[31].mxu1 }
 0x300   :  { %v4066_v59 = vmul.f32 -1.442695, %v1208_v56 }
 0x302   :  { %4768 = vpow2.f32 %v4066_v59  ;;  %v5299_v59 = vld [vmem:[%s5693_s0 + $0x4] sm:$0x1] }
 0x303   :  { %v1243_v60 = vpop.f32.mrb[28].mxu0  ;;  %v1465_v61 = vpop.f32.mrb[32].mxu1 }
 0x304   :  { %v1316_v62 = vadd.f32 %v1315_v43, %v1243_v60  ;;  %v4432_v63 = vpop.f32.mrb[29].mxu0  ;;  %v4458_v6 = vpop.f32.mrb[33].mxu1 }
 0x305   :  { %v1246_v9 = vpop.f32.mrb[30].mxu0  ;;  %v1468_v16 = vpop.f32.mrb[34].mxu1 }
 0x306   :  { %v1319_v18 = vadd.f32 %v5076_v31, %v1316_v62  ;;  %v4433_v19 = vpop.f32.mrb[31].mxu0  ;;  %v4459_v20 = vpop.f32.mrb[35].mxu1 }
 0x308   :  { %v4067_v22 = vmul.f32 -1.442695, %v1319_v18 }
 0x30a   :  { %4770 = vpow2.f32 %v4067_v22 }
 0x30b   :  { %v1426_v23 = vpop.f32.mrb[32].mxu0  ;;  %v1687_v55 = vpop.f32.mrb[36].mxu1 }
 0x30c   :  { %v4769_v24 = vpop.eup %4768  ;;  %v1427_v26 = vadd.f32 %v1426_v23, %v1354_v50  ;;  %v4451_v27 = vpop.f32.mrb[33].mxu0 }
 0x30d   :  { %v1545_v28 = vadd.f32 1.0, %v4769_v24  ;;  %v4477_v56 = vpop.f32.mrb[37].mxu1 }
 0x30e   :  { %v1430_v29 = vadd.f32 %v5082_v44, %v1427_v26 }
 0x30f   :  { %4772 = vrcp.f32 %v1545_v28  ;;  %v1537_v30 = vpop.f32.mrb[34].mxu0  ;;  %v1798_v57 = vpop.f32.mrb[38].mxu1 }
 0x310   :  { %4774 = vtanh.f32 %v1430_v29  ;;  %v1538_v33 = vadd.f32 %v1537_v30, %v1465_v61  ;;  %v4464_v35 = vpop.f32.mrb[35].mxu0  ;;  %v4490_v58 = vpop.f32.mrb[39].mxu1 }
 0x312   :  { %v1541_v36 = vadd.f32 %v5087_v47, %v1538_v33 }
 0x314   :  { %v4771_v37 = vpop.eup %4770  ;;  %v4068_v38 = vmul.f32 -1.442695, %v1541_v36 }
 0x315   :  { %v1551_v39 = vadd.f32 1.0, %v4771_v37 }
 0x316   :  { %4776 = vpow2.f32 %v4068_v38 }
 0x317   :  { %4778 = vrcp.f32 %v1551_v39 }
 0x319   :  { %v4773_v40 = vpop.eup %4772 }
 0x31a   :  { %v4775_v17 = vpop.eup %4774 }
 0x31b   :  { %v1562_v41 = vmul.f32 %v4775_v17, %v4773_v40 }
 0x320   :  { %v4777_v42 = vpop.eup %4776 }
 0x321   :  { %v4779_v43 = vpop.eup %4778  ;;  %v1558_v45 = vadd.f32 1.0, %v4777_v42 }
 0x322   :  { %v1561_v32 = vmul.f32 %v4779_v43, %v5174_v34 }
 0x323   :  { %4780 = vrcp.f32 %v1558_v45 }
 0x324   :  { %v5250_v48 = vadd.f32 %v1562_v41, %v1561_v32 }
 0x326   :  { %4782 = vtanh.f32 %v5250_v48 }
 0x32d   :  { %v4781_v49 = vpop.eup %4780 }
 0x330   :  { %v4783_v50 = vpop.eup %4782 }
 0x331   :  { %v1565_v51 = vmul.f32 %v4783_v50, %v4781_v49 }
 0x333   :  { %v1574_v52 = vpack.c.bf16 %v1565_v51, %v1565_v51  ;;  %v1566_v53 = vmax.f32 %v1565_v51, 0.0 }
 0x335   :  { %4470 = vmatmul.mubr.msk.bf16.vlgmr.msra.gmra.mrb[36].mxu0 %vm74_vm3, %v1574_v52  ;;  %4496 = vmatmul.mubr.msk.bf16.vlgmr.msra.gmra.mrb[40].mxu1 %vm74_vm3, %v1574_v52  ;;  %v1567_v54 = vmul.f32 %v1566_v53, %v5097_v21 }
 0x336   :  { %4479 = vmatpush3.bf16.msra.mxu0 %v4941_v3  ;;  %4505 = vmatpush3.bf16.msra.mxu1 %v4991_v11 }
 0x337   :  { %v1568_v34 = vsel %vm601_vm4, %v1567_v54, 0.0  ;;  %4480 = vmatprep.subr.bf16.mxu0 %v4882_v0  ;;  %4506 = vmatprep.subr.bf16.mxu1 %v4882_v0 }
 0x338   :  { %1569 = vadd.xlane.f32.xlu1 %v1568_v34  ;;  %4482 = vmatprep.mubr.msk.bf16.mxu0 %vm4883_vm0, %v4882_v0 }
 0x339   :  { %4508 = vmatprep.mubr.msk.bf16.mxu1 %vm4883_vm0, %v4882_v0 }
 0x33a   :  { %4481 = vmatpush3.bf16.msra.mxu0 %v4947_v4  ;;  %4507 = vmatpush3.bf16.msra.mxu1 %v5009_v13 }
 0x33b   :  { %4499 = vmatprep.subr.mxu0 %v4882_v0  ;;  %4525 = vmatprep.subr.mxu1 %v4882_v0 }
 0x33d   :  { %4483 = vmatmul.mubr.msk.bf16.vlgmr.msra.gmra.mrb[40].mxu0 %vm74_vm3, %v1574_v52  ;;  %4509 = vmatmul.mubr.msk.bf16.vlgmr.msra.gmra.mrb[44].mxu1 %vm74_vm3, %v1574_v52 }
 0x33e   :  { %4500 = vmatpush3.msk.msra.mxu0 %vm122_vm1, %v5002_v12  ;;  %4501 = vmatprep.mubr.msk.f32.mxu0 %vm4883_vm0, %v4882_v0 }
 0x33f   :  { %4512 = vmatprep.subr.mxu0 %v4882_v0  ;;  %4526 = vmatpush3.msk.msra.mxu1 %vm122_vm1, %v4955_v5 }
 0x340   :  { %4527 = vmatprep.mubr.msk.f32.mxu1 %vm4883_vm0, %v4882_v0  ;;  %4538 = vmatprep.subr.mxu1 %v4882_v0 }
 0x345   :  { %4502 = vmatmul.mubr.msk.f32.vlgmr.msra.gmra.mrb[44].mxu0 %vm118_vm2, %v5223_v46  ;;  %4528 = vmatmul.mubr.msk.f32.vlgmr.msra.gmra.mrb[48].mxu1 %vm118_vm2, %v5299_v59 }
 0x346   :  { %4513 = vmatpush3.msk.msra.mxu0 %vm122_vm1, %v5020_v14  ;;  %4514 = vmatprep.mubr.msk.f32.mxu0 %vm4883_vm0, %v4882_v0 }
 0x347   :  { %4517 = vmatprep.subr.bf16.mxu0 %v4882_v0  ;;  %4539 = vmatpush3.msk.msra.mxu1 %vm122_vm1, %v4984_v10 }
 0x348   :  { %4540 = vmatprep.mubr.msk.f32.mxu1 %vm4883_vm0, %v4882_v0  ;;  %4543 = vmatprep.subr.bf16.mxu1 %v4882_v0 }
 0x349   :  { %4515 = vmatmul.mubr.msk.f32.vlgmr.msra.gmra.mrb[46].mxu0 %vm118_vm2, %v5223_v46  ;;  %4541 = vmatmul.mubr.msk.f32.vlgmr.msra.gmra.mrb[50].mxu1 %vm118_vm2, %v5299_v59 }
 0x34a   :  { %4518 = vmatpush3.bf16.msra.mxu0 %v4924_v1  ;;  %4521 = vmatprep.mubr.msk.bf16.mxu0 %vm4883_vm0, %v4882_v0 }
 0x34b   :  { %4519 = vmatprep.subr.bf16.mxu0 %v4882_v0  ;;  %4544 = vmatpush3.bf16.msra.mxu1 %v4961_v7 }
 0x34c   :  { %4547 = vmatprep.mubr.msk.bf16.mxu1 %vm4883_vm0, %v4882_v0  ;;  %4545 = vmatprep.subr.bf16.mxu1 %v4882_v0 }
 0x34e   :  { %4520 = vmatpush3.bf16.msra.mxu0 %v4935_v2 }
 0x34f   :  { %4530 = vmatprep.subr.bf16.mxu0 %v4882_v0  ;;  %4546 = vmatpush3.bf16.msra.mxu1 %v4973_v8 }
 0x350   :  { %4556 = vmatprep.subr.bf16.mxu1 %v4882_v0 }
 0x3c5   :  { %v1570_v1 = vpop.xlane.xlu1 %1569 }
 0x3c6   :  { %v1571_v2 = vadd.f32 %v1570_v1, %v5162_v15 }
 0x3c8   :  { %3990 = vst.msk [vmem:[%s5697_s6 + $0x2] sm:$0x1] %vm3987_vm5, %v1571_v2 }
 0x408   :  { %v1612_v46 = vpop.f32.mrb[36].mxu0  ;;  %v1837_v60 = vpop.f32.mrb[40].mxu1 }
 0x409   :  { %v1688_v61 = vadd.f32 %v1687_v55, %v1612_v46  ;;  %v4471_v62 = vpop.f32.mrb[37].mxu0  ;;  %v4497_v63 = vpop.f32.mrb[41].mxu1 }
 0x40a   :  { %v1615_v6 = vpop.f32.mrb[38].mxu0  ;;  %v1840_v9 = vpop.f32.mrb[42].mxu1 }
 0x40b   :  { %v1691_v16 = vadd.f32 %v1688_v61, %v5070_v25  ;;  %v4472_v18 = vpop.f32.mrb[39].mxu0  ;;  %v4498_v19 = vpop.f32.mrb[43].mxu1 }
 0x40d   :  { %v4082_v20 = vmul.f32 -1.442695, %v1691_v16 }
 0x40f   :  { %4784 = vpow2.f32 %v4082_v20 }
 0x410   :  { %v1726_v22 = vpop.f32.mrb[40].mxu0  ;;  %v1948_v23 = vpop.f32.mrb[44].mxu1 }
 0x411   :  { %v1799_v24 = vadd.f32 %v1798_v57, %v1726_v22  ;;  %v4484_v26 = vpop.f32.mrb[41].mxu0  ;;  %v4510_v27 = vpop.f32.mrb[45].mxu1 }
 0x412   :  { %v1729_v28 = vpop.f32.mrb[42].mxu0  ;;  %v1951_v29 = vpop.f32.mrb[46].mxu1 }
 0x413   :  { %v1802_v30 = vadd.f32 %v5076_v31, %v1799_v24  ;;  %v4485_v33 = vpop.f32.mrb[43].mxu0  ;;  %v4511_v35 = vpop.f32.mrb[47].mxu1 }
 0x415   :  { %v4083_v36 = vmul.f32 -1.442695, %v1802_v30 }
 0x417   :  { %4786 = vpow2.f32 %v4083_v36 }
 0x418   :  { %v1909_v37 = vpop.f32.mrb[44].mxu0 }
 0x419   :  { %v4785_v38 = vpop.eup %4784  ;;  %v1910_v39 = vadd.f32 %v1909_v37, %v1837_v60  ;;  %v4503_v40 = vpop.f32.mrb[45].mxu0 }
 0x41a   :  { %v2028_v17 = vadd.f32 1.0, %v4785_v38 }
 0x41b   :  { %v1913_v41 = vadd.f32 %v5082_v44, %v1910_v39 }
 0x41c   :  { %4788 = vrcp.f32 %v2028_v17  ;;  %v2020_v42 = vpop.f32.mrb[46].mxu0 }
 0x41d   :  { %4790 = vtanh.f32 %v1913_v41  ;;  %v2021_v43 = vadd.f32 %v2020_v42, %v1948_v23  ;;  %v4516_v45 = vpop.f32.mrb[47].mxu0 }
 0x41f   :  { %v2024_v32 = vadd.f32 %v5087_v47, %v2021_v43 }
 0x421   :  { %v4787_v49 = vpop.eup %4786  ;;  %v4084_v50 = vmul.f32 -1.442695, %v2024_v32 }
 0x422   :  { %v2034_v51 = vadd.f32 1.0, %v4787_v49 }
 0x423   :  { %4792 = vpow2.f32 %v4084_v50 }
 0x424   :  { %4794 = vrcp.f32 %v2034_v51 }
 0x426   :  { %v4789_v52 = vpop.eup %4788 }
 0x427   :  { %v4791_v53 = vpop.eup %4790 }
 0x428   :  { %v2045_v54 = vmul.f32 %v4791_v53, %v4789_v52 }
 0x42d   :  { %v4793_v34 = vpop.eup %4792 }
 0x42e   :  { %v4795_v55 = vpop.eup %4794  ;;  %v2041_v56 = vadd.f32 1.0, %v4793_v34 }
 0x42f   :  { %v2044_v57 = vmul.f32 %v4795_v55, %v5250_v48 }
 0x430   :  { %4796 = vrcp.f32 %v2041_v56 }
 0x431   :  { %v5326_v58 = vadd.f32 %v2045_v54, %v2044_v57 }
 0x433   :  { %4798 = vtanh.f32 %v5326_v58 }
 0x43a   :  { %v4797_v1 = vpop.eup %4796 }
 0x43d   :  { %v4799_v2 = vpop.eup %4798 }
 0x43e   :  { %v2048_v46 = vmul.f32 %v4799_v2, %v4797_v1 }
 0x440   :  { %v2057_v60 = vpack.c.bf16 %v2048_v46, %v2048_v46  ;;  %v2049_v61 = vmax.f32 %v2048_v46, 0.0 }
 0x442   :  { %4522 = vmatmul.mubr.msk.bf16.vlgmr.msra.gmra.mrb[48].mxu0 %vm74_vm3, %v2057_v60  ;;  %4548 = vmatmul.mubr.msk.bf16.vlgmr.msra.gmra.mrb[52].mxu1 %vm74_vm3, %v2057_v60  ;;  %v2050_v62 = vmul.f32 %v2049_v61, %v5097_v21 }
 0x443   :  { %4531 = vmatpush3.bf16.msra.mxu0 %v4941_v3  ;;  %4557 = vmatpush3.bf16.msra.mxu1 %v4991_v11  ;;  %v5369_v3 = vld [vmem:[%s5691_s2] sm:$0xff]  }
 0x444   :  { %v2051_v48 = vsel %vm601_vm4, %v2050_v62, 0.0  ;;  %4532 = vmatprep.subr.bf16.mxu0 %v4882_v0  ;;  %4558 = vmatprep.subr.bf16.mxu1 %v4882_v0  ;;  %v5427_v62 = vld [vmem:[%s5691_s2 + $0x30] sm:$0xff]  }
 0x445   :  { %2052 = vadd.xlane.f32.xlu1 %v2051_v48  ;;  %4534 = vmatprep.mubr.msk.bf16.mxu0 %vm4883_vm0, %v4882_v0 }
 0x446   :  { %4560 = vmatprep.mubr.msk.bf16.mxu1 %vm4883_vm0, %v4882_v0 }
 0x447   :  { %4533 = vmatpush3.bf16.msra.mxu0 %v4947_v4  ;;  %4559 = vmatpush3.bf16.msra.mxu1 %v5009_v13  ;;  %v5378_v4 = vld [vmem:[%s5691_s2 + $0x8] sm:$0xff]  }
 0x448   :  { %4551 = vmatprep.subr.mxu0 %v4882_v0  ;;  %4577 = vmatprep.subr.mxu1 %v4882_v0 }
 0x44a   :  { %4535 = vmatmul.mubr.msk.bf16.vlgmr.msra.gmra.mrb[52].mxu0 %vm74_vm3, %v2057_v60  ;;  %4561 = vmatmul.mubr.msk.bf16.vlgmr.msra.gmra.mrb[56].mxu1 %vm74_vm3, %v2057_v60 }
 0x44b   :  { %4552 = vmatpush3.msk.msra.mxu0 %vm122_vm1, %v5002_v12  ;;  %4553 = vmatprep.mubr.msk.f32.mxu0 %vm4883_vm0, %v4882_v0 }
 0x44c   :  { %4564 = vmatprep.subr.mxu0 %v4882_v0  ;;  %4578 = vmatpush3.msk.msra.mxu1 %vm122_vm1, %v4955_v5  ;;  %v2170_v5 = vpop.f32.mrb[48].mxu1 }
 0x44d   :  { %4579 = vmatprep.mubr.msk.f32.mxu1 %vm4883_vm0, %v4882_v0  ;;  %4590 = vmatprep.subr.mxu1 %v4882_v0  ;;  %v4529_v11 = vpop.f32.mrb[49].mxu1 }
 0x44e   :  { %v2281_v12 = vpop.f32.mrb[50].mxu1  ;;  %v5456_v11 = vld [vmem:[%s5692_s1 + $0x8] sm:$0xf] }
 0x44f   :  { %v4542_v13 = vpop.f32.mrb[51].mxu1 }
 0x450   :  { %v5478_v13 = vld [vmem:[%s5692_s1 + $0xc] sm:$0xf] }
 0x452   :  { %4554 = vmatmul.mubr.msk.f32.vlgmr.msra.gmra.mrb[56].mxu0 %vm118_vm2, %v5299_v59 }
 0x453   :  { %4565 = vmatpush3.msk.msra.mxu0 %vm122_vm1, %v5020_v14  ;;  %4566 = vmatprep.mubr.msk.f32.mxu0 %vm4883_vm0, %v4882_v0  ;;  %v5385_v14 = vld [vmem:[%s5693_s0 + $0x5] sm:$0x1] }
 0x454   :  { %4569 = vmatprep.subr.bf16.mxu0 %v4882_v0  ;;  %4580 = vmatmul.mubr.msk.f32.vlgmr.msra.gmra.mrb[60].mxu1 %vm118_vm2, %v5385_v14 }
 0x455   :  { %4591 = vmatpush3.msk.msra.mxu1 %vm122_vm1, %v4984_v10  ;;  %4592 = vmatprep.mubr.msk.f32.mxu1 %vm4883_vm0, %v4882_v0 }
 0x456   :  { %4567 = vmatmul.mubr.msk.f32.vlgmr.msra.gmra.mrb[58].mxu0 %vm118_vm2, %v5299_v59  ;;  %4595 = vmatprep.subr.bf16.mxu1 %v4882_v0 }
 0x457   :  { %4570 = vmatpush3.bf16.msra.mxu0 %v5369_v3  ;;  %4573 = vmatprep.mubr.msk.bf16.mxu0 %vm4883_vm0, %v4882_v0 }
 0x458   :  { %4571 = vmatprep.subr.bf16.mxu0 %v4882_v0  ;;  %4593 = vmatmul.mubr.msk.f32.vlgmr.msra.gmra.mrb[62].mxu1 %vm118_vm2, %v5385_v14 }
 0x459   :  { %4596 = vmatpush3.bf16.msra.mxu1 %v4961_v7  ;;  %4599 = vmatprep.mubr.msk.bf16.mxu1 %vm4883_vm0, %v4882_v0 }
 0x45a   :  { %4597 = vmatprep.subr.bf16.mxu1 %v4882_v0 }
 0x45b   :  { %4572 = vmatpush3.bf16.msra.mxu0 %v5378_v4 }
 0x45c   :  { %4582 = vmatprep.subr.bf16.mxu0 %v4882_v0 }
 0x45d   :  { %4598 = vmatpush3.bf16.msra.mxu1 %v4973_v8 }
 0x45e   :  { %4608 = vmatprep.subr.bf16.mxu1 %v4882_v0 }
 0x4d2   :  { %v2053_v10 = vpop.xlane.xlu1 %2052 }
 0x4d3   :  { %v2054_v59 = vadd.f32 %v2053_v10, %v5162_v15 }
 0x4d5   :  { %3991 = vst.msk [vmem:[%s5697_s6 + $0x3] sm:$0x1] %vm3987_vm5, %v2054_v59 }
 0x515   :  { %v2095_v63 = vpop.f32.mrb[48].mxu0  ;;  %v2320_v6 = vpop.f32.mrb[52].mxu1 }
 0x516   :  { %v2171_v7 = vadd.f32 %v2170_v5, %v2095_v63  ;;  %v4523_v9 = vpop.f32.mrb[49].mxu0  ;;  %v4549_v16 = vpop.f32.mrb[53].mxu1  ;;  %v5446_v5 = vld [vmem:[%s5691_s2 + $0x38] sm:$0xff]  }
 0x517   :  { %v2098_v18 = vpop.f32.mrb[50].mxu0  ;;  %v2323_v19 = vpop.f32.mrb[54].mxu1  ;;  %v5515_v9 = vld [vmem:[%s5691_s2 + $0x20] sm:$0xff]   ;;  %v5524_v16 = vld [vmem:[%s5691_s2 + $0x28] sm:$0xff]  }
 0x518   :  { %v2174_v20 = vadd.f32 %v2171_v7, %v5070_v25  ;;  %v4524_v8 = vpop.f32.mrb[51].mxu0  ;;  %v4550_v22 = vpop.f32.mrb[55].mxu1  ;;  %v5496_v7 = vld [vmem:[%s5693_s0 + $0x6] sm:$0x1] }
 0x51a   :  { %v4098_v23 = vmul.f32 -1.442695, %v2174_v20 }
 0x51c   :  { %4800 = vpow2.f32 %v4098_v23 }
 0x51d   :  { %v2209_v24 = vpop.f32.mrb[52].mxu0  ;;  %v2431_v26 = vpop.f32.mrb[56].mxu1 }
 0x51e   :  { %v2282_v27 = vadd.f32 %v2281_v12, %v2209_v24  ;;  %v4536_v28 = vpop.f32.mrb[53].mxu0  ;;  %v4562_v29 = vpop.f32.mrb[57].mxu1  ;;  %v5466_v12 = vld [vmem:[%s5692_s1] sm:$0xf] }
 0x51f   :  { %v2212_v30 = vpop.f32.mrb[54].mxu0  ;;  %v2434_v33 = vpop.f32.mrb[58].mxu1  ;;  %v5536_v28 = vld [vmem:[%s5695_s3] sm:$0x1] }
 0x520   :  { %v2285_v35 = vadd.f32 %v5076_v31, %v2282_v27  ;;  %v4537_v36 = vpop.f32.mrb[55].mxu0  ;;  %v4563_v37 = vpop.f32.mrb[59].mxu1 }
 0x522   :  { %v4099_v38 = vmul.f32 -1.442695, %v2285_v35 }
 0x524   :  { %4802 = vpow2.f32 %v4099_v38 }
 0x525   :  { %v2392_v39 = vpop.f32.mrb[56].mxu0 }
 0x526   :  { %v4801_v40 = vpop.eup %4800  ;;  %v2393_v25 = vadd.f32 %v2392_v39, %v2320_v6  ;;  %v4555_v17 = vpop.f32.mrb[57].mxu0 }
 0x527   :  { %v2511_v41 = vadd.f32 1.0, %v4801_v40  ;;  %v2653_v10 = vpop.f32.mrb[60].mxu1  ;;  %v5542_v17 = vld [vmem:[%s5695_s3 + $0x1] sm:$0x1] }
 0x528   :  { %v2396_v42 = vadd.f32 %v5082_v44, %v2393_v25  ;;  %v4581_v59 = vpop.f32.mrb[61].mxu1 }
 0x529   :  { %4804 = vrcp.f32 %v2511_v41  ;;  %v2503_v43 = vpop.f32.mrb[58].mxu0 }
 0x52a   :  { %4806 = vtanh.f32 %v2396_v42  ;;  %v2504_v45 = vadd.f32 %v2503_v43, %v2431_v26  ;;  %v4568_v32 = vpop.f32.mrb[59].mxu0 }
 0x52b   :  { %v2764_v63 = vpop.f32.mrb[62].mxu1 }
 0x52c   :  { %v2507_v49 = vadd.f32 %v5087_v47, %v2504_v45  ;;  %v4594_v6 = vpop.f32.mrb[63].mxu1 }
 0x52e   :  { %v4803_v50 = vpop.eup %4802  ;;  %v4100_v31 = vmul.f32 -1.442695, %v2507_v49 }
 0x52f   :  { %v2517_v51 = vadd.f32 1.0, %v4803_v50 }
 0x530   :  { %4808 = vpow2.f32 %v4100_v31 }
 0x531   :  { %4810 = vrcp.f32 %v2517_v51 }
 0x533   :  { %v4805_v52 = vpop.eup %4804 }
 0x534   :  { %v4807_v53 = vpop.eup %4806 }
 0x535   :  { %v2528_v54 = vmul.f32 %v4807_v53, %v4805_v52  ;;  %v5548_v52 = vld [vmem:[%s5695_s3 + $0x2] sm:$0x1] }
 0x53a   :  { %v4809_v34 = vpop.eup %4808 }
 0x53b   :  { %v4811_v55 = vpop.eup %4810  ;;  %v2524_v56 = vadd.f32 1.0, %v4809_v34 }
 0x53c   :  { %v2527_v44 = vmul.f32 %v4811_v55, %v5326_v58  ;;  %v5421_v58 = vld [vmem:[%s5691_s2 + $0x10] sm:$0xff]  }
 0x53d   :  { %4812 = vrcp.f32 %v2524_v56  ;;  %v5554_v56 = vld [vmem:[%s5695_s3 + $0x3] sm:$0x1] }
 0x53e   :  { %v5412_v57 = vadd.f32 %v2528_v54, %v2527_v44 }
 0x540   :  { %4814 = vtanh.f32 %v5412_v57 }
 0x547   :  { %v4813_v1 = vpop.eup %4812 }
 0x54a   :  { %v4815_v47 = vpop.eup %4814 }
 0x54b   :  { %v2531_v2 = vmul.f32 %v4815_v47, %v4813_v1 }
 0x54d   :  { %v2540_v46 = vpack.c.bf16 %v2531_v2, %v2531_v2  ;;  %v2532_v60 = vmax.f32 %v2531_v2, 0.0 }
 0x54f   :  { %4574 = vmatmul.mubr.msk.bf16.vlgmr.msra.gmra.mrb[60].mxu0 %vm74_vm3, %v2540_v46  ;;  %4600 = vmatmul.mubr.msk.bf16.vlgmr.msra.gmra.mrb[64].mxu1 %vm74_vm3, %v2540_v46  ;;  %v2533_v61 = vmul.f32 %v2532_v60, %v5097_v21  ;;  %v5440_v21 = vld [vmem:[%s5691_s2 + $0x18] sm:$0xff]  }
 0x550   :  { %4583 = vmatpush3.bf16.msra.mxu0 %v5421_v58  ;;  %4609 = vmatpush3.bf16.msra.mxu1 %v5427_v62 }
 0x551   :  { %v2534_v48 = vsel %vm601_vm4, %v2533_v61, 0.0  ;;  %4584 = vmatprep.subr.bf16.mxu0 %v4882_v0  ;;  %4610 = vmatprep.subr.bf16.mxu1 %v4882_v0 }
 0x552   :  { %2535 = vadd.xlane.f32.xlu0 %v2534_v48  ;;  %4586 = vmatprep.mubr.msk.bf16.mxu0 %vm4883_vm0, %v4882_v0 }
 0x553   :  { %4612 = vmatprep.mubr.msk.bf16.mxu1 %vm4883_vm0, %v4882_v0 }
 0x554   :  { %4585 = vmatpush3.bf16.msra.mxu0 %v5440_v21  ;;  %4611 = vmatpush3.bf16.msra.mxu1 %v5446_v5 }
 0x555   :  { %4603 = vmatprep.subr.mxu0 %v4882_v0  ;;  %4629 = vmatprep.subr.mxu1 %v4882_v0 }
 0x557   :  { %4587 = vmatmul.mubr.msk.bf16.vlgmr.msra.gmra.mrb[64].mxu0 %vm74_vm3, %v2540_v46  ;;  %4613 = vmatmul.mubr.msk.bf16.vlgmr.msra.gmra.mrb[68].mxu1 %vm74_vm3, %v2540_v46 }
 0x558   :  { %4604 = vmatpush3.msk.msra.mxu0 %vm122_vm1, %v5456_v11  ;;  %4605 = vmatprep.mubr.msk.f32.mxu0 %vm4883_vm0, %v4882_v0 }
 0x559   :  { %4616 = vmatprep.subr.mxu0 %v4882_v0  ;;  %4630 = vmatpush3.msk.msra.mxu1 %vm122_vm1, %v5466_v12 }
 0x55a   :  { %4631 = vmatprep.mubr.msk.f32.mxu1 %vm4883_vm0, %v4882_v0  ;;  %4642 = vmatprep.subr.mxu1 %v4882_v0 }
 0x55f   :  { %4606 = vmatmul.mubr.msk.f32.vlgmr.msra.gmra.mrb[68].mxu0 %vm118_vm2, %v5385_v14  ;;  %4632 = vmatmul.mubr.msk.f32.vlgmr.msra.gmra.mrb[72].mxu1 %vm118_vm2, %v5496_v7 }
 0x560   :  { %4617 = vmatpush3.msk.msra.mxu0 %vm122_vm1, %v5478_v13  ;;  %4618 = vmatprep.mubr.msk.f32.mxu0 %vm4883_vm0, %v4882_v0 }
 0x561   :  { %4621 = vmatprep.subr.bf16.mxu0 %v4882_v0  ;;  %4644 = vmatprep.mubr.msk.f32.mxu1 %vm4883_vm0, %v4882_v0 }
 0x563   :  { %4619 = vmatmul.mubr.msk.f32.vlgmr.msra.gmra.mrb[70].mxu0 %vm118_vm2, %v5385_v14  ;;  %v5503_v14 = vld [vmem:[%s5692_s1 + $0x4] sm:$0xf] }
 0x564   :  { %4622 = vmatpush3.bf16.msra.mxu0 %v5369_v3  ;;  %4625 = vmatprep.mubr.msk.bf16.mxu0 %vm4883_vm0, %v4882_v0 }
 0x565   :  { %4623 = vmatprep.subr.bf16.mxu0 %v4882_v0  ;;  %4643 = vmatpush3.msk.msra.mxu1 %vm122_vm1, %v5503_v14 }
 0x566   :  { %4647 = vmatprep.subr.bf16.mxu1 %v4882_v0  ;;  %4645 = vmatmul.mubr.msk.f32.vlgmr.msra.gmra.mrb[74].mxu1 %vm118_vm2, %v5496_v7 }
 0x567   :  { %4648 = vmatpush3.bf16.msra.mxu1 %v5515_v9  ;;  %4651 = vmatprep.mubr.msk.bf16.mxu1 %vm4883_vm0, %v4882_v0 }
 0x568   :  { %4624 = vmatpush3.bf16.msra.mxu0 %v5378_v4  ;;  %4649 = vmatprep.subr.bf16.mxu1 %v4882_v0 }
 0x569   :  { %4634 = vmatprep.subr.bf16.mxu0 %v4882_v0 }
 0x56b   :  { %4650 = vmatpush3.bf16.msra.mxu1 %v5524_v16 }
 0x56c   :  { %4660 = vmatprep.subr.bf16.mxu1 %v4882_v0 }
 0x5df   :  { %v2536_v18 = vpop.xlane.xlu0 %2535 }
 0x5e0   :  { %v2537_v19 = vadd.f32 %v2536_v18, %v5162_v15 }
 0x5e2   :  { %3992 = vst.msk [vmem:[%s5697_s6 + $0x4] sm:$0x1] %vm3987_vm5, %v2537_v19 }
 0x622   :  { %v2578_v20 = vpop.f32.mrb[60].mxu0  ;;  %v2803_v8 = vpop.f32.mrb[64].mxu1 }
 0x623   :  { %v2654_v22 = vadd.f32 %v2653_v10, %v2578_v20  ;;  %v4575_v23 = vpop.f32.mrb[61].mxu0  ;;  %v4601_v24 = vpop.f32.mrb[65].mxu1 }
 0x624   :  { %v2581_v26 = vpop.f32.mrb[62].mxu0  ;;  %v2806_v27 = vpop.f32.mrb[66].mxu1  ;;  %v5566_v23 = vld [vmem:[%s5696_s4] sm:$0x1] }
 0x625   :  { %v2657_v29 = vadd.f32 %v5536_v28, %v2654_v22  ;;  %v4576_v15 = vpop.f32.mrb[63].mxu0  ;;  %v4602_v30 = vpop.f32.mrb[67].mxu1 }
 0x626   :  { %v5612_v15 = vld [vmem:[%s5693_s0 + $0x7] sm:$0x1] }
 0x627   :  { %v4114_v33 = vmul.f32 -1.442695, %v2657_v29 }
 0x629   :  { %4816 = vpow2.f32 %v4114_v33 }
 0x62a   :  { %v2692_v35 = vpop.f32.mrb[64].mxu0  ;;  %v2914_v36 = vpop.f32.mrb[68].mxu1 }
 0x62b   :  { %v2765_v37 = vadd.f32 %v2764_v63, %v2692_v35  ;;  %v4588_v38 = vpop.f32.mrb[65].mxu0  ;;  %v4614_v39 = vpop.f32.mrb[69].mxu1 }
 0x62c   :  { %v2695_v40 = vpop.f32.mrb[66].mxu0  ;;  %v2917_v25 = vpop.f32.mrb[70].mxu1 }
 0x62d   :  { %v2768_v41 = vadd.f32 %v5542_v17, %v2765_v37  ;;  %v4589_v42 = vpop.f32.mrb[67].mxu0  ;;  %v4615_v43 = vpop.f32.mrb[71].mxu1 }
 0x62f   :  { %v4115_v45 = vmul.f32 -1.442695, %v2768_v41 }
 0x631   :  { %4818 = vpow2.f32 %v4115_v45 }
 0x632   :  { %v2875_v32 = vpop.f32.mrb[68].mxu0 }
 0x633   :  { %v4817_v49 = vpop.eup %4816  ;;  %v2876_v50 = vadd.f32 %v2875_v32, %v2803_v8  ;;  %v4607_v31 = vpop.f32.mrb[69].mxu0 }
 0x634   :  { %v2994_v51 = vadd.f32 1.0, %v4817_v49 }
 0x635   :  { %v2879_v53 = vadd.f32 %v5548_v52, %v2876_v50 }
 0x636   :  { %4820 = vrcp.f32 %v2994_v51  ;;  %v2986_v54 = vpop.f32.mrb[70].mxu0 }
 0x637   :  { %4822 = vtanh.f32 %v2879_v53  ;;  %v2987_v34 = vadd.f32 %v2986_v54, %v2914_v36  ;;  %v4620_v55 = vpop.f32.mrb[71].mxu0 }
 0x639   :  { %v2990_v44 = vadd.f32 %v5554_v56, %v2987_v34 }
 0x63b   :  { %v4819_v1 = vpop.eup %4818  ;;  %v4116_v47 = vmul.f32 -1.442695, %v2990_v44 }
 0x63c   :  { %v3000_v2 = vadd.f32 1.0, %v4819_v1 }
 0x63d   :  { %4824 = vpow2.f32 %v4116_v47 }
 0x63e   :  { %4826 = vrcp.f32 %v3000_v2 }
 0x640   :  { %v4821_v46 = vpop.eup %4820 }
 0x641   :  { %v4823_v60 = vpop.eup %4822 }
 0x642   :  { %v3011_v61 = vmul.f32 %v4823_v60, %v4821_v46 }
 0x647   :  { %v4825_v48 = vpop.eup %4824 }
 0x648   :  { %v4827_v10 = vpop.eup %4826  ;;  %v3007_v59 = vadd.f32 1.0, %v4825_v48 }
 0x649   :  { %v3010_v63 = vmul.f32 %v4827_v10, %v5412_v57 }
 0x64a   :  { %4828 = vrcp.f32 %v3007_v59 }
 0x64b   :  { %v5558_v6 = vadd.f32 %v3011_v61, %v3010_v63 }
 0x64d   :  { %4830 = vtanh.f32 %v5558_v6 }
 0x654   :  { %v4829_v18 = vpop.eup %4828 }
 0x657   :  { %v4831_v19 = vpop.eup %4830 }
 0x658   :  { %v3014_v20 = vmul.f32 %v4831_v19, %v4829_v18 }
 0x65a   :  { %v3023_v8 = vpack.c.bf16 %v3014_v20, %v3014_v20  ;;  %v3015_v22 = vmax.f32 %v3014_v20, 0.0 }
 0x65c   :  { %4626 = vmatmul.mubr.msk.bf16.vlgmr.msra.gmra.mrb[72].mxu0 %vm74_vm3, %v3023_v8  ;;  %4652 = vmatmul.mubr.msk.bf16.vlgmr.msra.gmra.mrb[76].mxu1 %vm74_vm3, %v3023_v8  ;;  %v3016_v57 = vmul.f32 %v5566_v23, %v3015_v22 }
 0x65d   :  { %4635 = vmatpush3.bf16.msra.mxu0 %v5421_v58  ;;  %4661 = vmatpush3.bf16.msra.mxu1 %v5427_v62 }
 0x65e   :  { %v3017_v24 = vsel %vm601_vm4, %v3016_v57, 0.0  ;;  %4636 = vmatprep.subr.bf16.mxu0 %v4882_v0  ;;  %4662 = vmatprep.subr.bf16.mxu1 %v4882_v0 }
 0x65f   :  { %3018 = vadd.xlane.f32.xlu1 %v3017_v24  ;;  %4638 = vmatprep.mubr.msk.bf16.mxu0 %vm4883_vm0, %v4882_v0 }
 0x660   :  { %4664 = vmatprep.mubr.msk.bf16.mxu1 %vm4883_vm0, %v4882_v0 }
 0x661   :  { %4637 = vmatpush3.bf16.msra.mxu0 %v5440_v21  ;;  %4663 = vmatpush3.bf16.msra.mxu1 %v5446_v5 }
 0x662   :  { %4655 = vmatprep.subr.mxu0 %v4882_v0  ;;  %4681 = vmatprep.subr.mxu1 %v4882_v0 }
 0x664   :  { %4639 = vmatmul.mubr.msk.bf16.vlgmr.msra.gmra.mrb[76].mxu0 %vm74_vm3, %v3023_v8  ;;  %4665 = vmatmul.mubr.msk.bf16.vlgmr.msra.gmra.mrb[80].mxu1 %vm74_vm3, %v3023_v8 }
 0x665   :  { %4656 = vmatpush3.msk.msra.mxu0 %vm122_vm1, %v5456_v11  ;;  %4657 = vmatprep.mubr.msk.f32.mxu0 %vm4883_vm0, %v4882_v0 }
 0x666   :  { %4668 = vmatprep.subr.mxu0 %v4882_v0  ;;  %4682 = vmatpush3.msk.msra.mxu1 %vm122_vm1, %v5466_v12  ;;  %v3136_v12 = vpop.f32.mrb[72].mxu1 }
 0x667   :  { %4683 = vmatprep.mubr.msk.f32.mxu1 %vm4883_vm0, %v4882_v0  ;;  %4694 = vmatprep.subr.mxu1 %v4882_v0  ;;  %v4633_v26 = vpop.f32.mrb[73].mxu1 }
 0x668   :  { %v3247_v27 = vpop.f32.mrb[74].mxu1 }
 0x669   :  { %v4646_v29 = vpop.f32.mrb[75].mxu1 }
 0x66c   :  { %4658 = vmatmul.mubr.msk.f32.vlgmr.msra.gmra.mrb[80].mxu0 %vm118_vm2, %v5496_v7  ;;  %4684 = vmatmul.mubr.msk.f32.vlgmr.msra.gmra.mrb[84].mxu1 %vm118_vm2, %v5612_v15 }
 0x66d   :  { %4669 = vmatpush3.msk.msra.mxu0 %vm122_vm1, %v5478_v13  ;;  %4670 = vmatprep.mubr.msk.f32.mxu0 %vm4883_vm0, %v4882_v0 }
 0x66e   :  { %4673 = vmatprep.subr.bf16.mxu0 %v4882_v0  ;;  %4695 = vmatpush3.msk.msra.mxu1 %vm122_vm1, %v5503_v14 }
 0x66f   :  { %4696 = vmatprep.mubr.msk.f32.mxu1 %vm4883_vm0, %v4882_v0  ;;  %4699 = vmatprep.subr.bf16.mxu1 %v4882_v0 }
 0x670   :  { %4671 = vmatmul.mubr.msk.f32.vlgmr.msra.gmra.mrb[82].mxu0 %vm118_vm2, %v5496_v7  ;;  %4697 = vmatmul.mubr.msk.f32.vlgmr.msra.gmra.mrb[86].mxu1 %vm118_vm2, %v5612_v15 }
 0x671   :  { %4674 = vmatpush3.bf16.msra.mxu0 %v5369_v3  ;;  %4677 = vmatprep.mubr.msk.bf16.mxu0 %vm4883_vm0, %v4882_v0 }
 0x672   :  { %4675 = vmatprep.subr.bf16.mxu0 %v4882_v0  ;;  %4700 = vmatpush3.bf16.msra.mxu1 %v5515_v9 }
 0x673   :  { %4703 = vmatprep.mubr.msk.bf16.mxu1 %vm4883_vm0, %v4882_v0  ;;  %4701 = vmatprep.subr.bf16.mxu1 %v4882_v0 }
 0x675   :  { %4676 = vmatpush3.bf16.msra.mxu0 %v5378_v4  ;;  %v5629_v4 = vld [vmem:[#allocation2] sm:$0x1] }
 0x676   :  { %4686 = vmatprep.subr.bf16.mxu0 %v4882_v0  ;;  %4702 = vmatpush3.bf16.msra.mxu1 %v5524_v16 }
 0x677   :  { %4712 = vmatprep.subr.bf16.mxu1 %v4882_v0 }
 0x6ec   :  { %v3019_v3 = vpop.xlane.xlu1 %3018 }
 0x6ed   :  { %v3020_v7 = vadd.f32 %v5629_v4, %v3019_v3 }
 0x6ef   :  { %3993 = vst.msk [vmem:[%s5697_s6 + $0x5] sm:$0x1] %vm3987_vm5, %v3020_v7 }
 0x72f   :  { %v3061_v14 = vpop.f32.mrb[72].mxu0  ;;  %v3286_v9 = vpop.f32.mrb[76].mxu1 }
 0x730   :  { %v3137_v30 = vadd.f32 %v3136_v12, %v3061_v14  ;;  %v4627_v33 = vpop.f32.mrb[73].mxu0  ;;  %v4653_v35 = vpop.f32.mrb[77].mxu1 }
 0x731   :  { %v3064_v36 = vpop.f32.mrb[74].mxu0  ;;  %v3289_v37 = vpop.f32.mrb[78].mxu1 }
 0x732   :  { %v3140_v16 = vadd.f32 %v5536_v28, %v3137_v30  ;;  %v4628_v38 = vpop.f32.mrb[75].mxu0  ;;  %v4654_v39 = vpop.f32.mrb[79].mxu1 }
 0x734   :  { %v4130_v40 = vmul.f32 -1.442695, %v3140_v16 }
 0x736   :  { %4832 = vpow2.f32 %v4130_v40 }
 0x737   :  { %v3175_v25 = vpop.f32.mrb[76].mxu0  ;;  %v3397_v41 = vpop.f32.mrb[80].mxu1 }
 0x738   :  { %v3248_v42 = vadd.f32 %v3247_v27, %v3175_v25  ;;  %v4640_v43 = vpop.f32.mrb[77].mxu0  ;;  %v4666_v45 = vpop.f32.mrb[81].mxu1 }
 0x739   :  { %v3178_v32 = vpop.f32.mrb[78].mxu0  ;;  %v3400_v49 = vpop.f32.mrb[82].mxu1 }
 0x73a   :  { %v3251_v50 = vadd.f32 %v5542_v17, %v3248_v42  ;;  %v4641_v31 = vpop.f32.mrb[79].mxu0  ;;  %v4667_v51 = vpop.f32.mrb[83].mxu1 }
 0x73c   :  { %v4131_v53 = vmul.f32 -1.442695, %v3251_v50 }
 0x73e   :  { %4834 = vpow2.f32 %v4131_v53 }
 0x73f   :  { %v3358_v54 = vpop.f32.mrb[80].mxu0 }
 0x740   :  { %v4833_v34 = vpop.eup %4832  ;;  %v3359_v55 = vadd.f32 %v3358_v54, %v3286_v9  ;;  %v4659_v44 = vpop.f32.mrb[81].mxu0 }
 0x741   :  { %v3477_v1 = vadd.f32 1.0, %v4833_v34 }
 0x742   :  { %v3362_v47 = vadd.f32 %v5548_v52, %v3359_v55 }
 0x743   :  { %4836 = vrcp.f32 %v3477_v1  ;;  %v3469_v2 = vpop.f32.mrb[82].mxu0 }
 0x744   :  { %4838 = vtanh.f32 %v3362_v47  ;;  %v3470_v46 = vadd.f32 %v3469_v2, %v3397_v41  ;;  %v4672_v60 = vpop.f32.mrb[83].mxu0 }
 0x746   :  { %v3473_v61 = vadd.f32 %v5554_v56, %v3470_v46 }
 0x748   :  { %v4835_v48 = vpop.eup %4834  ;;  %v4132_v10 = vmul.f32 -1.442695, %v3473_v61 }
 0x749   :  { %v3483_v59 = vadd.f32 1.0, %v4835_v48 }
 0x74a   :  { %4840 = vpow2.f32 %v4132_v10 }
 0x74b   :  { %4842 = vrcp.f32 %v3483_v59 }
 0x74d   :  { %v4837_v63 = vpop.eup %4836 }
 0x74e   :  { %v4839_v18 = vpop.eup %4838 }
 0x74f   :  { %v3494_v19 = vmul.f32 %v4839_v18, %v4837_v63 }
 0x754   :  { %v4841_v20 = vpop.eup %4840 }
 0x755   :  { %v4843_v8 = vpop.eup %4842  ;;  %v3490_v22 = vadd.f32 1.0, %v4841_v20 }
 0x756   :  { %v3493_v57 = vmul.f32 %v4843_v8, %v5558_v6 }
 0x757   :  { %4844 = vrcp.f32 %v3490_v22 }
 0x758   :  { %v5641_v24 = vadd.f32 %v3494_v19, %v3493_v57 }
 0x75a   :  { %4846 = vtanh.f32 %v5641_v24 }
 0x761   :  { %v4845_v12 = vpop.eup %4844 }
 0x764   :  { %v4847_v26 = vpop.eup %4846 }
 0x765   :  { %v3497_v27 = vmul.f32 %v4847_v26, %v4845_v12 }
 0x767   :  { %v3506_v29 = vpack.c.bf16 %v3497_v27, %v3497_v27  ;;  %v3498_v3 = vmax.f32 %v3497_v27, 0.0 }
 0x769   :  { %4678 = vmatmul.mubr.msk.bf16.vlgmr.msra.gmra.mrb[84].mxu0 %vm74_vm3, %v3506_v29  ;;  %4704 = vmatmul.mubr.msk.bf16.vlgmr.msra.gmra.mrb[88].mxu1 %vm74_vm3, %v3506_v29  ;;  %v3499_v7 = vmul.f32 %v5566_v23, %v3498_v3 }
 0x76a   :  { %4687 = vmatpush3.bf16.msra.mxu0 %v5421_v58  ;;  %4713 = vmatpush3.bf16.msra.mxu1 %v5427_v62  ;;  %v3619_v58 = vpop.f32.mrb[84].mxu1 }
 0x76b   :  { %v3500_v6 = vsel %vm601_vm4, %v3499_v7, 0.0  ;;  %4688 = vmatprep.subr.bf16.mxu0 %v4882_v0  ;;  %4714 = vmatprep.subr.bf16.mxu1 %v4882_v0  ;;  %v4685_v62 = vpop.f32.mrb[85].mxu1 }
 0x76c   :  { %3501 = vadd.xlane.f32.xlu0 %v3500_v6  ;;  %4690 = vmatprep.mubr.msk.bf16.mxu0 %vm4883_vm0, %v4882_v0 }
 0x76d   :  { %4716 = vmatprep.mubr.msk.bf16.mxu1 %vm4883_vm0, %v4882_v0 }
 0x76e   :  { %4689 = vmatpush3.bf16.msra.mxu0 %v5440_v21  ;;  %4715 = vmatpush3.bf16.msra.mxu1 %v5446_v5  ;;  %v3730_v21 = vpop.f32.mrb[86].mxu1 }
 0x76f   :  { %4707 = vmatprep.subr.mxu0 %v4882_v0  ;;  %v4698_v5 = vpop.f32.mrb[87].mxu1 }
 0x771   :  { %4691 = vmatmul.mubr.msk.bf16.vlgmr.msra.gmra.mrb[88].mxu0 %vm74_vm3, %v3506_v29  ;;  %4717 = vmatmul.mubr.msk.bf16.vlgmr.msra.gmra.mrb[92].mxu1 %vm74_vm3, %v3506_v29 }
 0x772   :  { %4708 = vmatpush3.msk.msra.mxu0 %vm122_vm1, %v5456_v11  ;;  %4709 = vmatprep.mubr.msk.f32.mxu0 %vm4883_vm0, %v4882_v0 }
 0x773   :  { %4720 = vmatprep.subr.mxu0 %v4882_v0 }
 0x779   :  { %4710 = vmatmul.mubr.msk.f32.vlgmr.msra.gmra.mrb[92].mxu0 %vm118_vm2, %v5612_v15 }
 0x77a   :  { %4721 = vmatpush3.msk.msra.mxu0 %vm122_vm1, %v5478_v13  ;;  %4722 = vmatprep.mubr.msk.f32.mxu0 %vm4883_vm0, %v4882_v0 }
 0x77d   :  { %4723 = vmatmul.mubr.msk.f32.vlgmr.msra.gmra.mrb[94].mxu0 %vm118_vm2, %v5612_v15 }
 0x7f9   :  { %v3502_v11 = vpop.xlane.xlu0 %3501 }
 0x7fa   :  { %v3503_v14 = vadd.f32 %v5629_v4, %v3502_v11 }
 0x7fc   :  { %3994 = vst.msk [vmem:[%s5697_s6 + $0x6] sm:$0x1] %vm3987_vm5, %v3503_v14 }
 0x83c   :  { %v3544_v9 = vpop.f32.mrb[84].mxu0  ;;  %v3769_v13 = vpop.f32.mrb[88].mxu1 }
 0x83d   :  { %v3620_v30 = vadd.f32 %v3619_v58, %v3544_v9  ;;  %v4679_v33 = vpop.f32.mrb[85].mxu0  ;;  %v4705_v0 = vpop.f32.mrb[89].mxu1 }
 0x83e   :  { %v3547_v35 = vpop.f32.mrb[86].mxu0  ;;  %v3772_v36 = vpop.f32.mrb[90].mxu1 }
 0x83f   :  { %v3623_v15 = vadd.f32 %v5536_v28, %v3620_v30  ;;  %v4680_v37 = vpop.f32.mrb[87].mxu0  ;;  %v4706_v16 = vpop.f32.mrb[91].mxu1 }
 0x841   :  { %v4146_v38 = vmul.f32 -1.442695, %v3623_v15 }
 0x843   :  { %4848 = vpow2.f32 %v4146_v38 }
 0x844   :  { %v3658_v39 = vpop.f32.mrb[88].mxu0  ;;  %v3880_v40 = vpop.f32.mrb[92].mxu1 }
 0x845   :  { %v3731_v25 = vadd.f32 %v3730_v21, %v3658_v39  ;;  %v4692_v41 = vpop.f32.mrb[89].mxu0  ;;  %v4718_v42 = vpop.f32.mrb[93].mxu1 }
 0x846   :  { %v3661_v43 = vpop.f32.mrb[90].mxu0  ;;  %v3883_v45 = vpop.f32.mrb[94].mxu1 }
 0x847   :  { %v3734_v32 = vadd.f32 %v5542_v17, %v3731_v25  ;;  %v4693_v49 = vpop.f32.mrb[91].mxu0  ;;  %v4719_v50 = vpop.f32.mrb[95].mxu1 }
 0x849   :  { %v4147_v31 = vmul.f32 -1.442695, %v3734_v32 }
 0x84b   :  { %4850 = vpow2.f32 %v4147_v31 }
 0x84c   :  { %v3841_v51 = vpop.f32.mrb[92].mxu0 }
 0x84d   :  { %v4849_v53 = vpop.eup %4848  ;;  %v3842_v28 = vadd.f32 %v3841_v51, %v3769_v13  ;;  %v4711_v54 = vpop.f32.mrb[93].mxu0 }
 0x84e   :  { %v3960_v34 = vadd.f32 1.0, %v4849_v53 }
 0x84f   :  { %v3845_v55 = vadd.f32 %v5548_v52, %v3842_v28 }
 0x850   :  { %4852 = vrcp.f32 %v3960_v34  ;;  %v3952_v44 = vpop.f32.mrb[94].mxu0 }
 0x851   :  { %4854 = vtanh.f32 %v3845_v55  ;;  %v3953_v1 = vadd.f32 %v3952_v44, %v3880_v40  ;;  %v4724_v47 = vpop.f32.mrb[95].mxu0 }
 0x853   :  { %v3956_v2 = vadd.f32 %v5554_v56, %v3953_v1 }
 0x855   :  { %v4851_v46 = vpop.eup %4850  ;;  %v4148_v17 = vmul.f32 -1.442695, %v3956_v2 }
 0x856   :  { %v3966_v60 = vadd.f32 1.0, %v4851_v46 }
 0x857   :  { %4856 = vpow2.f32 %v4148_v17 }
 0x858   :  { %4858 = vrcp.f32 %v3966_v60 }
 0x85a   :  { %v4853_v61 = vpop.eup %4852 }
 0x85b   :  { %v4855_v48 = vpop.eup %4854 }
 0x85c   :  { %v3977_v10 = vmul.f32 %v4855_v48, %v4853_v61 }
 0x861   :  { %v4857_v59 = vpop.eup %4856 }
 0x862   :  { %v4859_v63 = vpop.eup %4858  ;;  %v3973_v18 = vadd.f32 1.0, %v4857_v59 }
 0x863   :  { %v3976_v52 = vmul.f32 %v4859_v63, %v5641_v24 }
 0x864   :  { %4860 = vrcp.f32 %v3973_v18 }
 0x865   :  { %v3978_v19 = vadd.f32 %v3977_v10, %v3976_v52 }
 0x867   :  { %4862 = vtanh.f32 %v3978_v19 }
 0x86e   :  { %v4861_v20 = vpop.eup %4860 }
 0x871   :  { %v4863_v8 = vpop.eup %4862 }
 0x872   :  { %v3980_v22 = vmul.f32 %v4863_v8, %v4861_v20 }
 0x874   :  { %v3981_v56 = vmax.f32 %v3980_v22, 0.0 }
 0x876   :  { %v3982_v57 = vmul.f32 %v5566_v23, %v3981_v56 }
 0x878   :  { %v3983_v12 = vsel %vm601_vm4, %v3982_v57, 0.0 }
 0x879   :  { %3984 = vadd.xlane.f32.xlu1 %v3983_v12 }
 0x906   :  { %v3985_v26 = vpop.xlane.xlu1 %3984 }
 0x907   :  { %v3986_v27 = vadd.f32 %v5629_v4, %v3985_v26 }
 0x909   :  { %3995 = vst.msk [vmem:[%s5697_s6 + $0x7] sm:$0x1] %vm3987_vm5, %v3986_v27 }

</bundles_post_ra>
